<compile_context>
chip_gen: v7x
topology: tpu7x:2x2x1
jax: 0.10.0
libtpu: 0.0.40
codegen_flags: <defaults>
</compile_context>

<pallas_src>
import math
from functools import partial

import jax
import jax.numpy as jnp
from jax.experimental import pallas as pl
from jax.experimental.pallas import tpu as pltpu

EMB_DIM = 32
N_HEADS = 4
CONTEXT_LEN = 8
EPS = 1e-5
GELU_C = math.sqrt(2.0 / math.pi)
NEG_BIG = -1e30  # additive mask bias; exp underflows to exactly 0, matching -inf semantics


def _block_kernel(x_ref, wbig_ref, w2_ref, vec_ref, bias_ref, out_ref, *,
                  batch_per_step, tokens, n_heads):
    x = x_ref[...]                               # (R, D) f32, R = batch_per_step * tokens
    R, D = x.shape
    H = n_heads
    hd = D // H
    Bg = batch_per_step
    T = tokens
    D3, D4 = 3 * D, 4 * D

    # Packed per-feature vectors: one (8, 4D) tile -> a single DMA.
    ln1_s = vec_ref[0:1, :D]
    ln1_b = vec_ref[1:2, :D]
    bo    = vec_ref[2:3, :D]
    ln2_s = vec_ref[3:4, :D]
    ln2_b = vec_ref[4:5, :D]
    b2    = vec_ref[5:6, :D]
    b1    = vec_ref[6:7, :]                      # (1, 4D)

    def layernorm(v, scale, shift):
        mean = jnp.mean(v, axis=-1, keepdims=True)
        var = jnp.mean((v - mean) ** 2, axis=-1, keepdims=True)      # unbiased=False
        return scale * ((v - mean) * jax.lax.rsqrt(var + EPS)) + shift

    # ------------------------- attention branch -------------------------
    h1 = layernorm(x, ln1_s, ln1_b)

    # Fused QKV projection (1/sqrt(hd) already folded into the Q weight columns).
    qkv = jnp.dot(h1, wbig_ref[:, :D3], preferred_element_type=jnp.float32)   # (R, 3D)
    qkv = pltpu.einshape("mgd->gmd", qkv.reshape(R, 3 * H, hd))               # (3H, R, hd)

    # Fold (head, batch) into one leading batch axis -> per-batch (T, T) causal attention.
    qh = qkv[0:H].reshape(H * Bg, T, hd)
    kh = qkv[H:2 * H].reshape(H * Bg, T, hd)
    vh = qkv[2 * H:].reshape(H * Bg, T, hd)

    s = jnp.einsum("gqd,gkd->gqk", qh, kh, preferred_element_type=jnp.float32)   # (H*Bg, T, T)
    s = s + bias_ref[...]                        # hoisted (T, T) additive causal bias
    m = jnp.max(s, axis=-1, keepdims=True)
    e = jnp.exp(s - m)                           # masked entries -> exactly 0
    p = e * pl.reciprocal(jnp.sum(e, axis=-1, keepdims=True), approx=False)      # exact, EUP
    ctx = jnp.einsum("gqk,gkd->gqd", p, vh, preferred_element_type=jnp.float32)  # (H*Bg, T, hd)
    ctx = pltpu.einshape("hmd->mhd", ctx.reshape(H, R, hd)).reshape(R, D)

    attn = jnp.dot(ctx, wbig_ref[:, D3:D4], preferred_element_type=jnp.float32) + bo
    x1 = x + attn                                # residual 1 (dropout p = 0)

    # ------------------------- feed-forward branch -------------------------
    h2 = layernorm(x1, ln2_s, ln2_b)
    f = jnp.dot(h2, wbig_ref[:, D4:], preferred_element_type=jnp.float32) + b1   # (R, 4D)
    g = 0.5 * f * (1.0 + jnp.tanh(GELU_C * (f + 0.044715 * f * f * f)))          # tanh-GELU
    # Full-width (R, D) store; D=32 < 128 lanes is fixed by the module config (see review
    # note for v5e) — at production D keep the last dim a multiple of 128.
    out_ref[...] = x1 + jnp.dot(g, w2_ref[...], preferred_element_type=jnp.float32) + b2


def transformer_block(x, params, *, num_groups=None):
    B, T, D = x.shape
    H = N_HEADS
    hd = D // H
    D4 = 4 * D
    BT = B * T
    inv_scale = 1.0 / math.sqrt(hd)

    if num_groups is None:
        # Shard across v7x's 2 TensorCores only once each grid step has >=128 activation
        # rows (fills the MXU sublane dim); smaller shapes keep one step so 1-TC chips
        # (v5e/v6e) don't pay extra per-step pipeline overhead.
        num_groups = 2 if (B % 2 == 0 and (B * T) // 2 >= 128) else 1
    assert B % num_groups == 0, "batch must divide evenly into groups"
    Bg = B // num_groups
    R = Bg * T

    # ----------------- host-side packing (one-time / constant-folded under jit) -----------------
    # w_big = [ wq^T * 1/sqrt(hd) | wk^T | wv^T | wo^T | W1^T ]  -> (D, 8D), a single DMA.
    w_big = jnp.concatenate(
        [params["wq_t"] * inv_scale, params["wk_t"], params["wv_t"],
         params["wo_t"], params["w1_t"]], axis=1).astype(jnp.float32)

    def _row(p, width):
        r = jnp.zeros((1, D4), jnp.float32)
        return r.at[0, :width].set(p.reshape(-1).astype(jnp.float32))

    vec = jnp.concatenate(
        [_row(params["ln1_s"], D), _row(params["ln1_b"], D), _row(params["bo"], D),
         _row(params["ln2_s"], D), _row(params["ln2_b"], D), _row(params["b2"], D),
         _row(params["b1"], D4), jnp.zeros((1, D4), jnp.float32)],
        axis=0)                                              # (8, 4D) -> single VMEM tile

    # Static per-batch causal mask, hoisted out of the kernel as an additive bias.
    causal = jnp.tril(jnp.ones((T, T), dtype=jnp.bool_))
    bias = jnp.where(causal, 0.0, NEG_BIG).astype(jnp.float32)    # (T, T)

    kernel = partial(_block_kernel, batch_per_step=Bg, tokens=T, n_heads=H)

    # NOTE(scaling): at production sizes (D >= 1024) do NOT keep all weights resident —
    # tile the FFN matmuls over a K/N "arbitrary" grid axis with pl.Buffered(2-3) weight
    # BlockSpecs sized for v7x's 64 MiB VMEM, set vmem_limit_bytes, cast matmul operands to
    # bf16 (keep preferred_element_type=f32), and prefetch the next layer's weights across
    # pallas_calls instead of re-fetching cold.
    out = pl.pallas_call(
        kernel,
        out_shape=jax.ShapeDtypeStruct((BT, D), jnp.float32),
        grid=(num_groups,),
        in_specs=[
            pl.BlockSpec((R, D), lambda g: (g, 0)),        # activations for this batch group
            pl.BlockSpec((D, 8 * D), lambda g: (0, 0)),    # [wq*s | wk | wv | wo | W1]
            pl.BlockSpec((D4, D), lambda g: (0, 0)),       # W2^T
            pl.BlockSpec((8, D4), lambda g: (0, 0)),       # packed ln scales/shifts + biases
            pl.BlockSpec((T, T), lambda g: (0, 0)),        # causal additive bias
        ],
        out_specs=pl.BlockSpec((R, D), lambda g: (g, 0)),
        input_output_aliases={0: 0},                        # x slab read before out block stored
        compiler_params=pltpu.CompilerParams(dimension_semantics=("parallel",)),
    )(x.reshape(BT, D), w_big, params["w2_t"], vec, bias)

    return out.reshape(B, T, D)


# ---------------- pure-JAX reference (mirrors the PyTorch forward) ----------------
def reference_block(x, params):
    def layernorm(v, s, b):
        mean = v.mean(-1, keepdims=True)
        var = ((v - mean) ** 2).mean(-1, keepdims=True)
        return s * ((v - mean) / jnp.sqrt(var + EPS)) + b

    B, T, D = x.shape
    H, hd = N_HEADS, D // N_HEADS

    h1 = layernorm(x, params["ln1_s"][0], params["ln1_b"][0])
    q = h1 @ params["wq_t"]
    k = h1 @ params["wk_t"]
    v = h1 @ params["wv_t"]
    q = q.reshape(B, T, H, hd).transpose(0, 2, 1, 3)
    k = k.reshape(B, T, H, hd).transpose(0, 2, 1, 3)
    v = v.reshape(B, T, H, hd).transpose(0, 2, 1, 3)
    s = q @ k.transpose(0, 1, 3, 2)
    mask = jnp.triu(jnp.ones((T, T), bool), 1)
    s = jnp.where(mask, -jnp.inf, s)
    w = jax.nn.softmax(s / math.sqrt(hd), axis=-1)
    ctx = (w @ v).transpose(0, 2, 1, 3).reshape(B, T, D)
    attn = ctx @ params["wo_t"] + params["bo"][0]
    x1 = x + attn
    h2 = layernorm(x1, params["ln2_s"][0], params["ln2_b"][0])
    f = h2 @ params["w1_t"] + params["b1"][0]
    g = 0.5 * f * (1.0 + jnp.tanh(math.sqrt(2.0 / math.pi) * (f + 0.044715 * f ** 3)))
    return x1 + (g @ params["w2_t"] + params["b2"][0])


def init_params(key, emb_dim):
    D, D4 = emb_dim, 4 * emb_dim
    ks = jax.random.split(key, 8)
    std = 0.02

    def lin(k, out_f, in_f):  # PyTorch Linear stores (out, in); kernel uses the transpose
        return (std * jax.random.normal(k, (out_f, in_f), jnp.float32)).T

    return {
        "ln1_s": jnp.ones((1, D), jnp.float32),
        "ln1_b": jnp.zeros((1, D), jnp.float32),
        "wq_t": lin(ks[0], D, D),
        "wk_t": lin(ks[1], D, D),
        "wv_t": lin(ks[2], D, D),
        "wo_t": lin(ks[3], D, D),
        "bo": 0.01 * jax.random.normal(ks[4], (1, D), jnp.float32),
        "ln2_s": jnp.ones((1, D), jnp.float32),
        "ln2_b": jnp.zeros((1, D), jnp.float32),
        "w1_t": lin(ks[5], D4, D),
        "b1": 0.01 * jax.random.normal(ks[6], (1, D4), jnp.float32),
        "w2_t": lin(ks[7], D, D4),
        "b2": jnp.zeros((1, D), jnp.float32),
    }


if __name__ == "__main__":
    # cfg = {emb_dim: 32, context_length: 8, n_heads: 4, drop_rate: 0.0, qkv_bias: False}
    key = jax.random.PRNGKey(0)
    pkey, xkey, x2key = jax.random.split(key, 3)
    params = init_params(pkey, EMB_DIM)

    # Small config consistent with the module.
    B, T, D = 2, CONTEXT_LEN, EMB_DIM
    x = jax.random.normal(xkey, (B, T, D), jnp.float32)
    out = jax.block_until_ready(transformer_block(x, params))
    ref = reference_block(x, params)
    assert out.shape == (B, T, D)
    assert jnp.allclose(out, ref, atol=1e-4, rtol=1e-4), float(jnp.abs(out - ref).max())

    # Larger batch: 128 rows per grid step (fills MXU sublanes) and a 2-step "parallel" grid
    # that shards across v7x's two TensorCores — exercises the multi-group code path.
    B2 = 32
    x2 = jax.random.normal(x2key, (B2, T, D), jnp.float32)
    out2 = jax.block_until_ready(transformer_block(x2, params))
    ref2 = reference_block(x2, params)
    assert jnp.allclose(out2, ref2, atol=1e-4, rtol=1e-4), float(jnp.abs(out2 - ref2).max())

    print("KERNEL_OK")
</pallas_src>

<mosaic_0001>
module attributes {stable_mosaic.version = 11 : i64} {
  func.func @_block_kernel(%arg0: i32, %arg1: memref<16x32xf32, #tpu.memory_space<vmem>>, %arg2: memref<32x256xf32, #tpu.memory_space<vmem>>, %arg3: memref<128x32xf32, #tpu.memory_space<vmem>>, %arg4: memref<8x128xf32, #tpu.memory_space<vmem>>, %arg5: memref<8x8xf32, #tpu.memory_space<vmem>>, %arg6: memref<16x32xf32, #tpu.memory_space<vmem>>) attributes {dimension_semantics = [#tpu.dimension_semantics<parallel>], iteration_bounds = array<i64: 1>, scalar_prefetch = 0 : i64, scratch_operands = 0 : i64, tpu.core_type = #tpu.core_type<tc>, window_params = [{transform_indices = @transform_0, window_bounds = array<i64: 16, 32>}, {pipeline_mode = #tpu.pipeline_mode<synchronous>, transform_indices = @transform_1, window_bounds = array<i64: 32, 256>}, {pipeline_mode = #tpu.pipeline_mode<synchronous>, transform_indices = @transform_2, window_bounds = array<i64: 128, 32>}, {pipeline_mode = #tpu.pipeline_mode<synchronous>, transform_indices = @transform_3, window_bounds = array<i64: 8, 128>}, {pipeline_mode = #tpu.pipeline_mode<synchronous>, transform_indices = @transform_4, window_bounds = array<i64: 8, 8>}, {transform_indices = @transform_5, window_bounds = array<i64: 16, 32>}]} {
    %c0 = arith.constant 0 : index
    %c0_0 = arith.constant 0 : index
    %0 = vector.load %arg1[%c0, %c0_0] : memref<16x32xf32, #tpu.memory_space<vmem>>, vector<16x32xf32>
    %c0_1 = arith.constant 0 : index
    %c0_2 = arith.constant 0 : index
    %1 = vector.load %arg4[%c0_1, %c0_2] : memref<8x128xf32, #tpu.memory_space<vmem>>, vector<1x32xf32>
    %c1 = arith.constant 1 : index
    %c0_3 = arith.constant 0 : index
    %2 = vector.load %arg4[%c1, %c0_3] : memref<8x128xf32, #tpu.memory_space<vmem>>, vector<1x32xf32>
    %c2 = arith.constant 2 : index
    %c0_4 = arith.constant 0 : index
    %3 = vector.load %arg4[%c2, %c0_4] : memref<8x128xf32, #tpu.memory_space<vmem>>, vector<1x32xf32>
    %c3 = arith.constant 3 : index
    %c0_5 = arith.constant 0 : index
    %4 = vector.load %arg4[%c3, %c0_5] : memref<8x128xf32, #tpu.memory_space<vmem>>, vector<1x32xf32>
    %c4 = arith.constant 4 : index
    %c0_6 = arith.constant 0 : index
    %5 = vector.load %arg4[%c4, %c0_6] : memref<8x128xf32, #tpu.memory_space<vmem>>, vector<1x32xf32>
    %c5 = arith.constant 5 : index
    %c0_7 = arith.constant 0 : index
    %6 = vector.load %arg4[%c5, %c0_7] : memref<8x128xf32, #tpu.memory_space<vmem>>, vector<1x32xf32>
    %c6 = arith.constant 6 : index
    %c0_8 = arith.constant 0 : index
    %7 = vector.load %arg4[%c6, %c0_8] : memref<8x128xf32, #tpu.memory_space<vmem>>, vector<1x128xf32>
    %cst = arith.constant dense<0.000000e+00> : vector<16xf32>
    %8 = vector.multi_reduction <add>, %0, %cst [1] : vector<16x32xf32> to vector<16xf32>
    %9 = vector.shape_cast %8 : vector<16xf32> to vector<16x1xf32>
    %cst_9 = arith.constant 3.200000e+01 : f32
    %10 = vector.broadcast %cst_9 : f32 to vector<16x1xf32>
    %11 = arith.divf %9, %10 : vector<16x1xf32>
    %12 = vector.broadcast %11 : vector<16x1xf32> to vector<16x32xf32>
    %13 = arith.subf %0, %12 : vector<16x32xf32>
    %14 = arith.mulf %13, %13 : vector<16x32xf32>
    %cst_10 = arith.constant dense<0.000000e+00> : vector<16xf32>
    %15 = vector.multi_reduction <add>, %14, %cst_10 [1] : vector<16x32xf32> to vector<16xf32>
    %16 = vector.shape_cast %15 : vector<16xf32> to vector<16x1xf32>
    %cst_11 = arith.constant 3.200000e+01 : f32
    %17 = vector.broadcast %cst_11 : f32 to vector<16x1xf32>
    %18 = arith.divf %16, %17 : vector<16x1xf32>
    %19 = vector.broadcast %11 : vector<16x1xf32> to vector<16x32xf32>
    %20 = arith.subf %0, %19 : vector<16x32xf32>
    %cst_12 = arith.constant 9.99999974E-6 : f32
    %21 = vector.broadcast %cst_12 : f32 to vector<16x1xf32>
    %22 = arith.addf %18, %21 : vector<16x1xf32>
    %23 = math.rsqrt %22 : vector<16x1xf32>
    %24 = vector.broadcast %23 : vector<16x1xf32> to vector<16x32xf32>
    %25 = arith.mulf %20, %24 : vector<16x32xf32>
    %26 = vector.broadcast %1 : vector<1x32xf32> to vector<16x32xf32>
    %27 = arith.mulf %26, %25 : vector<16x32xf32>
    %28 = vector.broadcast %2 : vector<1x32xf32> to vector<16x32xf32>
    %29 = arith.addf %27, %28 : vector<16x32xf32>
    %c0_13 = arith.constant 0 : index
    %c0_14 = arith.constant 0 : index
    %30 = vector.load %arg2[%c0_13, %c0_14] : memref<32x256xf32, #tpu.memory_space<vmem>>, vector<32x96xf32>
    %cst_15 = arith.constant dense<0.000000e+00> : vector<16x96xf32>
    %31 = tpu.matmul %29, %30, %cst_15 {dimension_numbers = #tpu.dot_dimension_numbers<[1], [0], [0], [1], [0, 0, 1, 1], [], []>} : vector<16x32xf32>, vector<32x96xf32>, vector<16x96xf32> -> vector<16x96xf32>
    %32 = vector.shape_cast %31 : vector<16x96xf32> to vector<16x12x8xf32>
    %33 = tpu.transpose %32, [1, 0, 2] : vector<16x12x8xf32> -> vector<12x16x8xf32>
    %34 = vector.extract_strided_slice %33 {offsets = [0, 0, 0], sizes = [4, 16, 8], strides = [1, 1, 1]} : vector<12x16x8xf32> to vector<4x16x8xf32>
    %35 = vector.shape_cast %34 : vector<4x16x8xf32> to vector<8x8x8xf32>
    %36 = vector.extract_strided_slice %33 {offsets = [4, 0, 0], sizes = [4, 16, 8], strides = [1, 1, 1]} : vector<12x16x8xf32> to vector<4x16x8xf32>
    %37 = vector.shape_cast %36 : vector<4x16x8xf32> to vector<8x8x8xf32>
    %38 = vector.extract_strided_slice %33 {offsets = [8, 0, 0], sizes = [4, 16, 8], strides = [1, 1, 1]} : vector<12x16x8xf32> to vector<4x16x8xf32>
    %39 = vector.shape_cast %38 : vector<4x16x8xf32> to vector<8x8x8xf32>
    "tpu.trace_start"() <{level = 10 : i32, message = "gqd,gkd->gqk"}> : () -> ()
    %cst_16 = arith.constant dense<0.000000e+00> : vector<8x8x8xf32>
    %40 = tpu.matmul %35, %37, %cst_16 {dimension_numbers = #tpu.dot_dimension_numbers<[2], [2], [1], [1], [0, 0, 0, 1, 1, 1], [0], [0]>} : vector<8x8x8xf32>, vector<8x8x8xf32>, vector<8x8x8xf32> -> vector<8x8x8xf32>
    "tpu.trace_stop"() : () -> ()
    %c0_17 = arith.constant 0 : index
    %c0_18 = arith.constant 0 : index
    %41 = vector.load %arg5[%c0_17, %c0_18] : memref<8x8xf32, #tpu.memory_space<vmem>>, vector<8x8xf32>
    %42 = vector.shape_cast %41 : vector<8x8xf32> to vector<1x8x8xf32>
    %43 = vector.broadcast %42 : vector<1x8x8xf32> to vector<8x8x8xf32>
    %44 = arith.addf %40, %43 : vector<8x8x8xf32>
    %cst_19 = arith.constant dense<0xFF800000> : vector<8x8xf32>
    %45 = vector.multi_reduction <maximumf>, %44, %cst_19 [2] : vector<8x8x8xf32> to vector<8x8xf32>
    %46 = vector.shape_cast %45 : vector<8x8xf32> to vector<8x8x1xf32>
    %47 = vector.broadcast %46 : vector<8x8x1xf32> to vector<8x8x8xf32>
    %48 = arith.subf %44, %47 : vector<8x8x8xf32>
    %49 = math.exp %48 : vector<8x8x8xf32>
    %cst_20 = arith.constant dense<0.000000e+00> : vector<8x8xf32>
    %50 = vector.multi_reduction <add>, %49, %cst_20 [2] : vector<8x8x8xf32> to vector<8x8xf32>
    %51 = vector.shape_cast %50 : vector<8x8xf32> to vector<8x8x1xf32>
    %52 = tpu.reciprocal %51 : vector<8x8x1xf32> -> vector<8x8x1xf32>
    %53 = vector.broadcast %52 : vector<8x8x1xf32> to vector<8x8x8xf32>
    %54 = arith.mulf %49, %53 : vector<8x8x8xf32>
    "tpu.trace_start"() <{level = 10 : i32, message = "gqk,gkd->gqd"}> : () -> ()
    %cst_21 = arith.constant dense<0.000000e+00> : vector<8x8x8xf32>
    %55 = tpu.matmul %54, %39, %cst_21 {dimension_numbers = #tpu.dot_dimension_numbers<[2], [1], [1], [2], [0, 0, 0, 1, 1, 2], [0], [0]>} : vector<8x8x8xf32>, vector<8x8x8xf32>, vector<8x8x8xf32> -> vector<8x8x8xf32>
    "tpu.trace_stop"() : () -> ()
    %56 = vector.shape_cast %55 : vector<8x8x8xf32> to vector<4x16x8xf32>
    %57 = tpu.transpose %56, [1, 0, 2] : vector<4x16x8xf32> -> vector<16x4x8xf32>
    %58 = vector.shape_cast %57 : vector<16x4x8xf32> to vector<16x32xf32>
    %c0_22 = arith.constant 0 : index
    %c96 = arith.constant 96 : index
    %59 = vector.load %arg2[%c0_22, %c96] : memref<32x256xf32, #tpu.memory_space<vmem>>, vector<32x32xf32>
    %cst_23 = arith.constant dense<0.000000e+00> : vector<16x32xf32>
    %60 = tpu.matmul %58, %59, %cst_23 {dimension_numbers = #tpu.dot_dimension_numbers<[1], [0], [0], [1], [0, 0, 1, 1], [], []>} : vector<16x32xf32>, vector<32x32xf32>, vector<16x32xf32> -> vector<16x32xf32>
    %61 = vector.broadcast %3 : vector<1x32xf32> to vector<16x32xf32>
    %62 = arith.addf %60, %61 : vector<16x32xf32>
    %63 = arith.addf %0, %62 : vector<16x32xf32>
    %cst_24 = arith.constant dense<0.000000e+00> : vector<16xf32>
    %64 = vector.multi_reduction <add>, %63, %cst_24 [1] : vector<16x32xf32> to vector<16xf32>
    %65 = vector.shape_cast %64 : vector<16xf32> to vector<16x1xf32>
    %cst_25 = arith.constant 3.200000e+01 : f32
    %66 = vector.broadcast %cst_25 : f32 to vector<16x1xf32>
    %67 = arith.divf %65, %66 : vector<16x1xf32>
    %68 = vector.broadcast %67 : vector<16x1xf32> to vector<16x32xf32>
    %69 = arith.subf %63, %68 : vector<16x32xf32>
    %70 = arith.mulf %69, %69 : vector<16x32xf32>
    %cst_26 = arith.constant dense<0.000000e+00> : vector<16xf32>
    %71 = vector.multi_reduction <add>, %70, %cst_26 [1] : vector<16x32xf32> to vector<16xf32>
    %72 = vector.shape_cast %71 : vector<16xf32> to vector<16x1xf32>
    %cst_27 = arith.constant 3.200000e+01 : f32
    %73 = vector.broadcast %cst_27 : f32 to vector<16x1xf32>
    %74 = arith.divf %72, %73 : vector<16x1xf32>
    %75 = vector.broadcast %67 : vector<16x1xf32> to vector<16x32xf32>
    %76 = arith.subf %63, %75 : vector<16x32xf32>
    %cst_28 = arith.constant 9.99999974E-6 : f32
    %77 = vector.broadcast %cst_28 : f32 to vector<16x1xf32>
    %78 = arith.addf %74, %77 : vector<16x1xf32>
    %79 = math.rsqrt %78 : vector<16x1xf32>
    %80 = vector.broadcast %79 : vector<16x1xf32> to vector<16x32xf32>
    %81 = arith.mulf %76, %80 : vector<16x32xf32>
    %82 = vector.broadcast %4 : vector<1x32xf32> to vector<16x32xf32>
    %83 = arith.mulf %82, %81 : vector<16x32xf32>
    %84 = vector.broadcast %5 : vector<1x32xf32> to vector<16x32xf32>
    %85 = arith.addf %83, %84 : vector<16x32xf32>
    %c0_29 = arith.constant 0 : index
    %c128 = arith.constant 128 : index
    %86 = vector.load %arg2[%c0_29, %c128] : memref<32x256xf32, #tpu.memory_space<vmem>>, vector<32x128xf32>
    %cst_30 = arith.constant dense<0.000000e+00> : vector<16x128xf32>
    %87 = tpu.matmul %85, %86, %cst_30 {dimension_numbers = #tpu.dot_dimension_numbers<[1], [0], [0], [1], [0, 0, 1, 1], [], []>} : vector<16x32xf32>, vector<32x128xf32>, vector<16x128xf32> -> vector<16x128xf32>
    %88 = vector.broadcast %7 : vector<1x128xf32> to vector<16x128xf32>
    %89 = arith.addf %87, %88 : vector<16x128xf32>
    %cst_31 = arith.constant 5.000000e-01 : f32
    %90 = vector.broadcast %cst_31 : f32 to vector<16x128xf32>
    %91 = arith.mulf %90, %89 : vector<16x128xf32>
    %cst_32 = arith.constant 4.471500e-02 : f32
    %92 = vector.broadcast %cst_32 : f32 to vector<16x128xf32>
    %93 = arith.mulf %92, %89 : vector<16x128xf32>
    %94 = arith.mulf %93, %89 : vector<16x128xf32>
    %95 = arith.mulf %94, %89 : vector<16x128xf32>
    %96 = arith.addf %89, %95 : vector<16x128xf32>
    %cst_33 = arith.constant 0.797884583 : f32
    %97 = vector.broadcast %cst_33 : f32 to vector<16x128xf32>
    %98 = arith.mulf %97, %96 : vector<16x128xf32>
    %99 = math.tanh %98 : vector<16x128xf32>
    %cst_34 = arith.constant 1.000000e+00 : f32
    %100 = vector.broadcast %cst_34 : f32 to vector<16x128xf32>
    %101 = arith.addf %100, %99 : vector<16x128xf32>
    %102 = arith.mulf %91, %101 : vector<16x128xf32>
    %c0_35 = arith.constant 0 : index
    %c0_36 = arith.constant 0 : index
    %103 = vector.load %arg3[%c0_35, %c0_36] : memref<128x32xf32, #tpu.memory_space<vmem>>, vector<128x32xf32>
    %cst_37 = arith.constant dense<0.000000e+00> : vector<16x32xf32>
    %104 = tpu.matmul %102, %103, %cst_37 {dimension_numbers = #tpu.dot_dimension_numbers<[1], [0], [0], [1], [0, 0, 1, 1], [], []>} : vector<16x128xf32>, vector<128x32xf32>, vector<16x32xf32> -> vector<16x32xf32>
    %105 = arith.addf %63, %104 : vector<16x32xf32>
    %106 = vector.broadcast %6 : vector<1x32xf32> to vector<16x32xf32>
    %107 = arith.addf %105, %106 : vector<16x32xf32>
    %c0_38 = arith.constant 0 : index
    %c0_39 = arith.constant 0 : index
    %108 = vector.load %arg6[%c0_38, %c0_39] : memref<16x32xf32, #tpu.memory_space<vmem>>, vector<16x32xf32>
    tpu.vector_store %arg6[%c0_38, %c0_39], %107 {strides = array<i32>} : memref<16x32xf32, #tpu.memory_space<vmem>>, vector<16x32xf32>,
    return
  }
  func.func @transform_0(%arg0: i32) -> (i32, i32) {
    %c0_i32 = arith.constant 0 : i32
    %c0_i32_0 = arith.constant 0 : i32
    return %arg0, %c0_i32 : i32, i32
  }
  func.func @transform_1(%arg0: i32) -> (i32, i32) {
    %c0_i32 = arith.constant 0 : i32
    %c0_i32_0 = arith.constant 0 : i32
    %c0_i32_1 = arith.constant 0 : i32
    return %c0_i32, %c0_i32_0 : i32, i32
  }
  func.func @transform_2(%arg0: i32) -> (i32, i32) {
    %c0_i32 = arith.constant 0 : i32
    %c0_i32_0 = arith.constant 0 : i32
    %c0_i32_1 = arith.constant 0 : i32
    return %c0_i32, %c0_i32_0 : i32, i32
  }
  func.func @transform_3(%arg0: i32) -> (i32, i32) {
    %c0_i32 = arith.constant 0 : i32
    %c0_i32_0 = arith.constant 0 : i32
    %c0_i32_1 = arith.constant 0 : i32
    return %c0_i32, %c0_i32_0 : i32, i32
  }
  func.func @transform_4(%arg0: i32) -> (i32, i32) {
    %c0_i32 = arith.constant 0 : i32
    %c0_i32_0 = arith.constant 0 : i32
    %c0_i32_1 = arith.constant 0 : i32
    return %c0_i32, %c0_i32_0 : i32, i32
  }
  func.func @transform_5(%arg0: i32) -> (i32, i32) {
    %c0_i32 = arith.constant 0 : i32
    %c0_i32_0 = arith.constant 0 : i32
    return %arg0, %c0_i32 : i32, i32
  }
}

</mosaic_0001>

<bundles_post_ra>
// kernel: tpu_custom_call.1
= control target key start
LH: loop header
LB: loop body
LE: loop exit
PB: predicated region body
PF: predicated region fallthrough
CT: control target
= control target key end

     0   :  { %10 = vsyncpa [#allocation3], 0  ;;  %s4012_s0 = inlined_call_operand.hbm [shape: f32[16,32], index: 0, kind: input, shape index: {}, may-alias: {0,5}]   ;;  %s4013_s1 = inlined_call_operand.vmem [shape: f32[32,256], index: 1, kind: input, shape index: {}]   ;;  %s4014_s2 = inlined_call_operand.vmem [shape: f32[128,32], index: 2, kind: input, shape index: {}]   ;;  %s4015_s3 = inlined_call_operand.vmem [shape: f32[8,128], index: 3, kind: input, shape index: {}]   ;;  %s4016_s4 = inlined_call_operand.vmem [shape: f32[8,8], index: 4, kind: input, shape index: {}]   ;;  %s4017_s5 = inlined_call_operand.hbm [shape: f32[16,32], index: 5, kind: output, shape index: {}, may-alias: {0,5}]  }
   0x1   :  { %11 = vsyncpa [#allocation4], 0  ;;  %s3468_s18 = smov [#allocation2]   ;;  %s3420_s22 = scalar_lea.hbm %s4012_s0, 256 }
   0x2   :  { %s17_s19 = sshll.u32 %s3468_s18, 4  ;;  %p3421_p0 = scmp.ne.s32.totalorder %s4012_s0, %s3420_s22  ;;  %s18_s19 = int_to_ptr.vmem [resolvable:$true] %s17_s19 }
   0x3   :  { %p3424_p1 = scmp.lt.u32.totalorder %s3420_s22, %s4012_s0 }
   0x5   :  { %p3426_p2 = pnand %p3424_p1, %p3421_p0 }
   0x7   :  { %3429 = shalt.err (!%p3426_p2)
}
   0x8   :  { %s3430_s27 = scalar_lea.vmem %s18_s19, 256  ;;  %p3435_p4 = scmp.lt.s32.totalorder %s18_s19, %s18_s19 }
   0x9   :  { %p3431_p3 = scmp.ne.s32.totalorder %s18_s19, %s3430_s27  ;;  %p3436_p5 = scmp.lt.s32.totalorder %s3430_s27, %s3430_s27 }
   0xb   :  { %p3437_p6 = por %p3436_p5, %p3435_p4 }
   0xd   :  { %p3438_p7 = pnand %p3437_p6, %p3431_p3 }
   0xf   :  { %3441 = shalt.err (!%p3438_p7)
}
  0x10   :  { %s3469_s28 = smov 128   ;;  %s3470_s29 = smov 8  }
  0x11   :  { %23 = dma.hbm_to_vmem [thread:$0]  %s4012_s0, 256, %s18_s19, [#allocation3], %s3469_s28, %s3469_s28, %s3470_s29  }
  0x12   :  { %3464 = dma.done.wait [#allocation3], 256  }
  0x13   :  { %3465 = vsyncadd [#allocation3], 4294967040  ;;  %vm44_vm0 = vcmask 261120   ;;  %v35_v0 = vld [vmem:[#allocation2] sm:$0xff]  ;;  %v36_v1 = vld [vmem:[#allocation2 + $0x8] sm:$0xff]  ;;  %s3471_s18 = smov 88   ;;  %v242_v41 = vlaneseq }
  0x14   :  { %v45_v2 = vsel %vm44_vm0, %v35_v0, 0.0  ;;  %v48_v3 = vsel %vm44_vm0, %v36_v1, 0.0  ;;  %v84_v14 = vld [vmem:[%s4013_s1] sm:$0xff]  ;;  %v85_v15 = vld [vmem:[%s4013_s1 + $0x10] sm:$0xff]  ;;  %s3472_s19 = smov 96   ;;  %s3473_s20 = smov 72  }
  0x15   :  { %46 = vadd.xlane.f32.xlu0 %v45_v2  ;;  %v86_v16 = vld [vmem:[%s4013_s1 + $0x20] sm:$0xff]  ;;  %v3286_v17 = vpack.c.bf16 %v85_v15, %v84_v14  ;;  %v87_v18 = vld [vmem:[%s4013_s1 + $0x30] sm:$0xff]  ;;  %s3474_s21 = smov 80   ;;  %s3475_s22 = smov 120   ;;  %v3478_v38 = vmov 0.0   ;;  %vm3479_vm1 = vmmov 0  }
  0x16   :  { %v3290_v19 = vpack.c.bf16 %v87_v18, %v86_v16  ;;  %v3009_v27 = vld [vmem:[%s4015_s3] ss:$0 sm:$0xff]  ;;  %v3010_v29 = vld [vmem:[%s4015_s3 + $0x1] ss:$0 sm:$0xff]  ;;  %s3476_s23 = smov 104   ;;  %s3477_s24 = smov 112   ;;  %3159 = vmatprep.subr.mxu0 %v3478_v38  ;;  %3161 = vmatprep.mubr.msk.f32.mxu0 %vm3479_vm1, %v3478_v38 }
  0x17   :  { %3287 = vmatprep.subr.bf16.mxu1 %v3286_v17  ;;  %v3480_v39 = vmov 1983009808   ;;  %v3481_v42 = vmov 1934713408   ;;  %v243_v45 = vshrl.u32 %v242_v41, 7  ;;  %vm1054_vm2 = vcmask 64512  }
  0x18   :  { %3289 = vmatpush3.bf16.msra.mxu1 %v3286_v17  ;;  %v240_v40 = vunpack.c.l.s4 %v3480_v39  ;;  %v304_v43 = vunpack.c.l.s4 %v3481_v42  ;;  %s3483_s27 = smov 48   ;;  %s3484_s30 = smov 64   ;;  %vm2633_vm3 = vcmask 130048   ;;  %vm2636_vm4 = vcmask 195584  }
  0x19   :  { %49 = vadd.xlane.f32.xlu0 %v48_v3  ;;  %3291 = vmatprep.subr.bf16.mxu1 %v3290_v19  ;;  %s3485_s6 = smov 40   ;;  %s3486_s14 = smov 32  }
  0x1a   :  { %v241_v44 = vunpack.c.0.s8 %v240_v40  ;;  %v305_v48 = vunpack.c.0.s8 %v304_v43  ;;  %s3487_s15 = smov 16   ;;  %s3488_s16 = smov 24  }
  0x1c   :  { %3293 = vmatpush3.bf16.msra.mxu1 %v3290_v19  ;;  %v3583_v49 = vsub.s32 %v241_v44, %v243_v45  ;;  %v3585_v56 = vsub.s32 %v305_v48, %v243_v45 }
  0x1d   :  { %3149 = vmatprep.subr.mxu1 %v3478_v38 }
  0xa2   :  { %v47_v4 = vpop.xlane.xlu0 %46 }
  0xa3   :  { %v52_v5 = vmul.f32 0.03125, %v47_v4 }
  0xa5   :  { %v54_v6 = vsub.f32 %v35_v0, %v52_v5 }
  0xa6   :  { %v50_v7 = vpop.xlane.xlu0 %49 }
  0xa7   :  { %v53_v8 = vmul.f32 0.03125, %v50_v7  ;;  %v56_v9 = vmul.f32 %v54_v6, %v54_v6 }
  0xa9   :  { %v55_v10 = vsub.f32 %v36_v1, %v53_v8  ;;  %v58_v11 = vsel %vm44_vm0, %v56_v9, 0.0 }
  0xaa   :  { %59 = vadd.xlane.f32.xlu1 %v58_v11 }
  0xab   :  { %v57_v12 = vmul.f32 %v55_v10, %v55_v10 }
  0xad   :  { %v61_v13 = vsel %vm44_vm0, %v57_v12, 0.0 }
  0xae   :  { %62 = vadd.xlane.f32.xlu1 %v61_v13 }
 0x137   :  { %v60_v20 = vpop.xlane.xlu1 %59 }
 0x138   :  { %v64_v21 = vmul.f32 0.03125, %v60_v20 }
 0x13a   :  { %v66_v22 = vadd.f32 1e-05, %v64_v21 }
 0x13b   :  { %v63_v23 = vpop.xlane.xlu1 %62 }
 0x13c   :  { %3374 = vrsqrt.f32 %v66_v22  ;;  %v65_v24 = vmul.f32 0.03125, %v63_v23 }
 0x13e   :  { %v67_v25 = vadd.f32 1e-05, %v65_v24 }
 0x140   :  { %3376 = vrsqrt.f32 %v67_v25 }
 0x146   :  { %v3375_v26 = vpop.eup %3374 }
 0x147   :  { %v70_v28 = vmul.f32 %v3375_v26, %v54_v6 }
 0x149   :  { %v76_v30 = vmul.f32 %v3009_v27, %v70_v28 }
 0x14a   :  { %v3377_v31 = vpop.eup %3376 }
 0x14b   :  { %v71_v32 = vmul.f32 %v3377_v31, %v55_v10  ;;  %v82_v33 = vadd.f32 %v3010_v29, %v76_v30 }
 0x14d   :  { %v77_v34 = vmul.f32 %v3009_v27, %v71_v32  ;;  %3146 = vmatprep.mubr.msk.f32.mxu1 %vm44_vm0, %v82_v33 }
 0x14f   :  { %v83_v35 = vadd.f32 %v3010_v29, %v77_v34 }
 0x151   :  { %3147 = vmatmul.mubr.msk.f32.vlgmr.msra.gmra.mrb[0].mxu1 %vm44_vm0, %v83_v35 }
 0x152   :  { %3151 = vmatprep.mubr.msk.f32.mxu1 %vm3479_vm1, %v3478_v38 }
 0x224   :  { %v3559_v36 = vpop.f32.mrb[0].mxu1 }
 0x225   :  { %197 = vrot.lane.b32.xlu0 %v3559_v36, %s3471_s18  ;;  %191 = vrot.lane.b32.xlu1 %v3559_v36, %s3472_s19  ;;  %v3563_v37 = vpop.f32.mrb[1].mxu1 }
 0x229   :  { %209 = vrot.lane.b32.xlu0 %v3559_v36, %s3473_s20  ;;  %203 = vrot.lane.b32.xlu1 %v3559_v36, %s3474_s21 }
 0x22d   :  { %173 = vrot.lane.b32.xlu1 %v3559_v36, %s3475_s22  ;;  %189 = vrot.lane.b32.xlu0 %v3563_v37, %s3472_s19 }
 0x231   :  { %195 = vrot.lane.b32.xlu1 %v3563_v37, %s3471_s18  ;;  %171 = vrot.lane.b32.xlu0 %v3563_v37, %s3475_s22 }
 0x235   :  { %201 = vrot.lane.b32.xlu1 %v3563_v37, %s3474_s21  ;;  %183 = vrot.lane.b32.xlu0 %v3563_v37, %s3476_s23 }
 0x239   :  { %207 = vrot.lane.b32.xlu1 %v3563_v37, %s3473_s20  ;;  %179 = vrot.lane.b32.xlu0 %v3559_v36, %s3477_s24 }
 0x23d   :  { %177 = vrot.lane.b32.xlu1 %v3563_v37, %s3477_s24 }
 0x241   :  { %185 = vrot.lane.b32.xlu1 %v3559_v36, %s3476_s23 }
 0x297   :  { %v198_v46 = vpop.permute.xlu0 %197  ;;  %v192_v47 = vpop.permute.xlu1 %191 }
 0x29b   :  { %v210_v50 = vpop.permute.xlu0 %209  ;;  %v204_v51 = vpop.permute.xlu1 %203 }
 0x29c   :  { %v489_v52 = vcombine.low %v198_v46, %v210_v50  ;;  %v490_v53 = vcombine.high %v198_v46, %v210_v50  ;;  %v473_v54 = vcombine.low %v192_v47, %v204_v51  ;;  %v474_v55 = vcombine.high %v192_v47, %v204_v51 }
 0x29e   :  { %v497_v57 = vrot.slane %v489_v52, %v3583_v49  ;;  %v504_v58 = vrot.slane %v490_v53, %v3583_v49  ;;  %v481_v59 = vrot.slane %v473_v54, %v3583_v49  ;;  %v488_v60 = vrot.slane %v474_v55, %v3583_v49 }
 0x29f   :  { %v3591_v61 = vpop.permute.xlu1 %173  ;;  %v190_v62 = vpop.permute.xlu0 %189 }
 0x2a0   :  { %v537_v63 = vcombine.low %v481_v59, %v497_v57  ;;  %v538_v0 = vcombine.high %v481_v59, %v497_v57  ;;  %v553_v1 = vcombine.low %v488_v60, %v504_v58  ;;  %v554_v2 = vcombine.high %v488_v60, %v504_v58 }
 0x2a2   :  { %v545_v3 = vrot.slane %v537_v63, %v3585_v56  ;;  %v552_v4 = vrot.slane %v538_v0, %v3585_v56  ;;  %v561_v5 = vrot.slane %v553_v1, %v3585_v56  ;;  %v568_v6 = vrot.slane %v554_v2, %v3585_v56 }
 0x2a3   :  { %v196_v7 = vpop.permute.xlu1 %195  ;;  %v172_v8 = vpop.permute.xlu0 %171 }
 0x2a4   :  { %v3022_v9 = vcombine.low %v545_v3, %v552_v4  ;;  %v3024_v10 = vcombine.high %v545_v3, %v552_v4  ;;  %v3026_v11 = vcombine.low %v561_v5, %v568_v6  ;;  %v3028_v12 = vcombine.high %v561_v5, %v568_v6 }
 0x2a6   :  { %v3598_v13 = vrot.slane %v3022_v9, %v3583_v49  ;;  %v3601_v14 = vrot.slane %v3024_v10, %v3583_v49  ;;  %v3604_v15 = vrot.slane %v3026_v11, %v3583_v49  ;;  %v3607_v16 = vrot.slane %v3028_v12, %v3583_v49 }
 0x2a7   :  { %v202_v17 = vpop.permute.xlu1 %201  ;;  %v184_v18 = vpop.permute.xlu0 %183 }
 0x2a8   :  { %v861_v19 = vcombine.low %v3598_v13, %v3601_v14  ;;  %v893_v20 = vcombine.low %v3604_v15, %v3607_v16  ;;  %v269_v21 = vcombine.low %v190_v62, %v202_v17  ;;  %v270_v22 = vcombine.high %v190_v62, %v202_v17 }
 0x2a9   :  { %v253_v23 = vcombine.low %v172_v8, %v184_v18  ;;  %v254_v28 = vcombine.high %v172_v8, %v184_v18 }
 0x2aa   :  { %v3614_v29 = vrot.slane %v861_v19, %v3585_v56  ;;  %v3617_v30 = vrot.slane %v893_v20, %v3585_v56  ;;  %v277_v31 = vrot.slane %v269_v21, %v3583_v49  ;;  %v284_v32 = vrot.slane %v270_v22, %v3583_v49 }
 0x2ab   :  { %v208_v24 = vpop.permute.xlu1 %207  ;;  %v180_v27 = vpop.permute.xlu0 %179  ;;  %v261_v35 = vrot.slane %v253_v23, %v3583_v49  ;;  %v268_v46 = vrot.slane %v254_v28, %v3583_v49 }
 0x2ac   :  { %v285_v25 = vcombine.low %v196_v7, %v208_v24  ;;  %v286_v26 = vcombine.high %v196_v7, %v208_v24  ;;  %v441_v39 = vcombine.low %v3559_v36, %v180_v27  ;;  %v442_v40 = vcombine.high %v3559_v36, %v180_v27 }
 0x2ad   :  { %v913_v50 = vcombine.low %v3614_v29, %v3617_v30 }
 0x2ae   :  { %v293_v33 = vrot.slane %v285_v25, %v3583_v49  ;;  %v300_v34 = vrot.slane %v286_v26, %v3583_v49  ;;  %v449_v55 = vrot.slane %v441_v39, %v3583_v49  ;;  %v456_v57 = vrot.slane %v442_v40, %v3583_v49 }
 0x2af   :  { %v178_v41 = vpop.permute.xlu1 %177 }
 0x2b0   :  { %v333_v42 = vcombine.low %v277_v31, %v293_v33  ;;  %v334_v43 = vcombine.high %v277_v31, %v293_v33  ;;  %v349_v44 = vcombine.low %v284_v32, %v300_v34  ;;  %v350_v45 = vcombine.high %v284_v32, %v300_v34 }
 0x2b1   :  { %v237_v47 = vcombine.low %v3563_v37, %v178_v41  ;;  %v238_v48 = vcombine.high %v3563_v37, %v178_v41 }
 0x2b2   :  { %v341_v51 = vrot.slane %v333_v42, %v3585_v56  ;;  %v348_v52 = vrot.slane %v334_v43, %v3585_v56  ;;  %v357_v53 = vrot.slane %v349_v44, %v3585_v56  ;;  %v364_v54 = vrot.slane %v350_v45, %v3585_v56 }
 0x2b3   :  { %v245_v58 = vrot.slane %v237_v47, %v3583_v49  ;;  %v252_v59 = vrot.slane %v238_v48, %v3583_v49  ;;  %v186_v17 = vpop.permute.xlu1 %185 }
 0x2b4   :  { %v3014_v60 = vcombine.low %v341_v51, %v348_v52  ;;  %v3016_v62 = vcombine.high %v341_v51, %v348_v52  ;;  %v3018_v63 = vcombine.low %v357_v53, %v364_v54  ;;  %v3020_v0 = vcombine.high %v357_v53, %v364_v54 }
 0x2b5   :  { %v301_v1 = vcombine.low %v245_v58, %v261_v35  ;;  %v302_v2 = vcombine.high %v245_v58, %v261_v35  ;;  %v317_v3 = vcombine.low %v252_v59, %v268_v46  ;;  %v318_v4 = vcombine.high %v252_v59, %v268_v46 }
 0x2b6   :  { %v660_v5 = vrot.slane %v3014_v60, %v3583_v49  ;;  %v676_v6 = vrot.slane %v3016_v62, %v3583_v49  ;;  %v692_v7 = vrot.slane %v3018_v63, %v3583_v49  ;;  %v708_v8 = vrot.slane %v3020_v0, %v3583_v49 }
 0x2b7   :  { %v309_v9 = vrot.slane %v301_v1, %v3585_v56  ;;  %v316_v10 = vrot.slane %v302_v2, %v3585_v56  ;;  %v325_v11 = vrot.slane %v317_v3, %v3585_v56  ;;  %v332_v12 = vrot.slane %v318_v4, %v3585_v56 }
 0x2b8   :  { %v725_v18 = vcombine.low %v660_v5, %v676_v6  ;;  %v726_v19 = vcombine.high %v660_v5, %v676_v6  ;;  %v757_v20 = vcombine.low %v692_v7, %v708_v8  ;;  %v758_v21 = vcombine.high %v692_v7, %v708_v8 }
 0x2b9   :  { %v3013_v22 = vcombine.low %v309_v9, %v316_v10  ;;  %v3015_v23 = vcombine.high %v309_v9, %v316_v10  ;;  %v3017_v24 = vcombine.low %v325_v11, %v332_v12  ;;  %v3019_v25 = vcombine.high %v325_v11, %v332_v12 }
 0x2ba   :  { %v457_v26 = vcombine.low %v3591_v61, %v186_v17  ;;  %v458_v27 = vcombine.high %v3591_v61, %v186_v17  ;;  %v733_v28 = vrot.slane %v725_v18, %v3585_v56  ;;  %v765_v31 = vrot.slane %v757_v20, %v3585_v56 }
 0x2bb   :  { %v653_v32 = vrot.slane %v3013_v22, %v3583_v49  ;;  %v669_v33 = vrot.slane %v3015_v23, %v3583_v49  ;;  %v685_v34 = vrot.slane %v3017_v24, %v3583_v49  ;;  %v701_v35 = vrot.slane %v3019_v25, %v3583_v49 }
 0x2bc   :  { %v465_v39 = vrot.slane %v457_v26, %v3583_v49  ;;  %v472_v40 = vrot.slane %v458_v27, %v3583_v49  ;;  %v777_v41 = vcombine.low %v733_v28, %v765_v31  ;;  %v778_v42 = vcombine.high %v733_v28, %v765_v31 }
 0x2bd   :  { %v709_v43 = vcombine.low %v653_v32, %v669_v33  ;;  %v710_v61 = vcombine.high %v653_v32, %v669_v33  ;;  %v741_v44 = vcombine.low %v685_v34, %v701_v35  ;;  %v742_v45 = vcombine.high %v685_v34, %v701_v35  ;;  %v1053_v32 = vld [vmem:[%s4016_s4] sm:$0xff]  ;;  %s3482_s4 = smov 56  }
 0x2be   :  { %v505_v46 = vcombine.low %v449_v55, %v465_v39  ;;  %v506_v47 = vcombine.high %v449_v55, %v465_v39  ;;  %v521_v48 = vcombine.low %v456_v57, %v472_v40  ;;  %v522_v51 = vcombine.high %v456_v57, %v472_v40  ;;  %3150 = vmatpush3.xpose.msk.msra.mxu1 %vm1054_vm2, %v777_v41 }
 0x2bf   :  { %3160 = vmatpush3.xpose.msk.msra.mxu0 %vm1054_vm2, %v778_v42  ;;  %3154 = vmatprep.subr.mxu1 %v3478_v38  ;;  %v717_v52 = vrot.slane %v709_v43, %v3585_v56  ;;  %v749_v53 = vrot.slane %v741_v44, %v3585_v56  ;;  %v740_v54 = vrot.slane %v726_v19, %v3585_v56 }
 0x2c0   :  { %v513_v58 = vrot.slane %v505_v46, %v3585_v56  ;;  %v520_v59 = vrot.slane %v506_v47, %v3585_v56  ;;  %v529_v55 = vrot.slane %v521_v48, %v3585_v56  ;;  %v536_v57 = vrot.slane %v522_v51, %v3585_v56  ;;  %3169 = vmatprep.subr.mxu0 %v3478_v38 }
 0x2c1   :  { %v773_v60 = vcombine.low %v717_v52, %v749_v53  ;;  %v774_v62 = vcombine.high %v717_v52, %v749_v53  ;;  %v772_v63 = vrot.slane %v758_v21, %v3585_v56  ;;  %v724_v0 = vrot.slane %v710_v61, %v3585_v56 }
 0x2c2   :  { %v3021_v1 = vcombine.low %v513_v58, %v520_v59  ;;  %v3023_v2 = vcombine.high %v513_v58, %v520_v59  ;;  %v3025_v3 = vcombine.low %v529_v55, %v536_v57  ;;  %v3027_v4 = vcombine.high %v529_v55, %v536_v57 }
 0x2c3   :  { %3152 = vmatmul.mubr.msk.f32.vlgmr.msra.gmra.mrb[2].mxu1 %vm1054_vm2, %v773_v60  ;;  %3162 = vmatmul.mubr.msk.f32.vlgmr.msra.gmra.mrb[0].mxu0 %vm1054_vm2, %v774_v62  ;;  %v779_v5 = vcombine.low %v740_v54, %v772_v63  ;;  %v756_v6 = vrot.slane %v742_v45, %v3585_v56  ;;  %v862_v18 = vcombine.high %v3598_v13, %v3601_v14 }
 0x2c4   :  { %v789_v7 = vrot.slane %v3021_v1, %v3583_v49  ;;  %v805_v8 = vrot.slane %v3023_v2, %v3583_v49  ;;  %v821_v9 = vrot.slane %v3025_v3, %v3583_v49  ;;  %v837_v10 = vrot.slane %v3027_v4, %v3583_v49  ;;  %3155 = vmatpush3.xpose.msk.msra.mxu1 %vm1054_vm2, %v913_v50 }
 0x2c5   :  { %3170 = vmatpush3.xpose.msk.msra.mxu0 %vm1054_vm2, %v779_v5  ;;  %3156 = vmatprep.mubr.msk.f32.mxu1 %vm3479_vm1, %v3478_v38  ;;  %v775_v17 = vcombine.low %v724_v0, %v756_v6  ;;  %v894_v19 = vcombine.high %v3604_v15, %v3607_v16  ;;  %v780_v50 = vcombine.high %v740_v54, %v772_v63 }
 0x2c6   :  { %v845_v11 = vcombine.low %v789_v7, %v805_v8  ;;  %v877_v12 = vcombine.low %v821_v9, %v837_v10  ;;  %3164 = vmatprep.subr.mxu1 %v3478_v38  ;;  %3171 = vmatprep.mubr.msk.f32.mxu0 %vm3479_vm1, %v3478_v38  ;;  %v846_v13 = vcombine.high %v789_v7, %v805_v8 }
 0x2c7   :  { %3179 = vmatprep.subr.mxu0 %v3478_v38  ;;  %v878_v14 = vcombine.high %v821_v9, %v837_v10  ;;  %v776_v16 = vcombine.high %v724_v0, %v756_v6  ;;  %v914_v22 = vcombine.high %v3614_v29, %v3617_v30  ;;  %v876_v23 = vrot.slane %v862_v18, %v3585_v56 }
 0x2c8   :  { %v853_v20 = vrot.slane %v845_v11, %v3585_v56  ;;  %v885_v21 = vrot.slane %v877_v12, %v3585_v56  ;;  %3172 = vmatmul.mubr.msk.f32.vlgmr.msra.gmra.mrb[2].mxu0 %vm1054_vm2, %v775_v17  ;;  %v908_v24 = vrot.slane %v894_v19, %v3585_v56  ;;  %v860_v26 = vrot.slane %v846_v13, %v3585_v56 }
 0x2c9   :  { %3180 = vmatpush3.xpose.msk.msra.mxu0 %vm1054_vm2, %v780_v50  ;;  %3181 = vmatprep.mubr.msk.f32.mxu0 %vm3479_vm1, %v3478_v38  ;;  %v892_v29 = vrot.slane %v878_v14, %v3585_v56 }
 0x2ca   :  { %v909_v15 = vcombine.low %v853_v20, %v885_v21  ;;  %3189 = vmatprep.subr.mxu0 %v3478_v38  ;;  %v910_v25 = vcombine.high %v853_v20, %v885_v21  ;;  %v915_v30 = vcombine.low %v876_v23, %v908_v24  ;;  %v916_v28 = vcombine.high %v876_v23, %v908_v24 }
 0x2cb   :  { %v911_v27 = vcombine.low %v860_v26, %v892_v29  ;;  %v912_v31 = vcombine.high %v860_v26, %v892_v29 }
 0x2cc   :  { %3157 = vmatmul.mubr.msk.f32.vlgmr.msra.gmra.mrb[4].mxu1 %vm1054_vm2, %v909_v15  ;;  %3182 = vmatmul.mubr.msk.f32.vlgmr.msra.gmra.mrb[4].mxu0 %vm1054_vm2, %v776_v16 }
 0x2cd   :  { %3165 = vmatpush3.xpose.msk.msra.mxu1 %vm1054_vm2, %v914_v22  ;;  %3166 = vmatprep.mubr.msk.f32.mxu1 %vm3479_vm1, %v3478_v38 }
 0x2ce   :  { %3174 = vmatprep.subr.mxu1 %v3478_v38  ;;  %3191 = vmatprep.mubr.msk.f32.mxu0 %vm3479_vm1, %v3478_v38 }
 0x2d0   :  { %3167 = vmatmul.mubr.msk.f32.vlgmr.msra.gmra.mrb[6].mxu1 %vm1054_vm2, %v910_v25 }
 0x2d1   :  { %3175 = vmatpush3.xpose.msk.msra.mxu1 %vm1054_vm2, %v915_v30  ;;  %3176 = vmatprep.mubr.msk.f32.mxu1 %vm3479_vm1, %v3478_v38 }
 0x2d2   :  { %3184 = vmatprep.subr.mxu1 %v3478_v38 }
 0x2d4   :  { %3177 = vmatmul.mubr.msk.f32.vlgmr.msra.gmra.mrb[8].mxu1 %vm1054_vm2, %v911_v27 }
 0x2d5   :  { %3185 = vmatpush3.xpose.msk.msra.mxu1 %vm1054_vm2, %v916_v28  ;;  %3186 = vmatprep.mubr.msk.f32.mxu1 %vm3479_vm1, %v3478_v38 }
 0x2d6   :  { %3194 = vmatprep.subr.mxu1 %v3478_v38 }
 0x2d8   :  { %3187 = vmatmul.mubr.msk.f32.vlgmr.msra.gmra.mrb[10].mxu1 %vm1054_vm2, %v912_v31 }
 0x2d9   :  { %3196 = vmatprep.mubr.msk.f32.mxu1 %vm3479_vm1, %v3478_v38 }
 0x396   :  { %v1127_v33 = vpop.f32.mrb[2].mxu1  ;;  %v1279_v34 = vpop.f32.mrb[0].mxu0 }
 0x397   :  { %v1128_v35 = vadd.f32 %v1127_v33, %v1053_v32  ;;  %v3153_v39 = vpop.f32.mrb[3].mxu1  ;;  %v3163_v40 = vpop.f32.mrb[1].mxu0  ;;  %v1280_v41 = vadd.f32 %v1279_v34, %v1053_v32 }
 0x399   :  { %v1663_v42 = vsel %vm1054_vm2, %v1128_v35, -inf  ;;  %v1669_v44 = vsel %vm1054_vm2, %v1280_v41, -inf }
 0x39a   :  { %1664 = vmax.xlane.f32.xlu0 %v1663_v42 }
 0x39b   :  { %v1431_v43 = vpop.f32.mrb[2].mxu0 }
 0x39c   :  { %v3173_v61 = vpop.f32.mrb[3].mxu0  ;;  %v1432_v59 = vadd.f32 %v1431_v43, %v1053_v32 }
 0x39e   :  { %1670 = vmax.xlane.f32.xlu0 %v1669_v44  ;;  %v1675_v0 = vsel %vm1054_vm2, %v1432_v59, -inf }
 0x39f   :  { %v1203_v45 = vpop.f32.mrb[4].mxu1  ;;  %v1583_v46 = vpop.f32.mrb[4].mxu0 }
 0x3a0   :  { %v1204_v47 = vadd.f32 %v1203_v45, %v1053_v32  ;;  %v3158_v48 = vpop.f32.mrb[5].mxu1  ;;  %v3183_v51 = vpop.f32.mrb[5].mxu0  ;;  %v1584_v63 = vadd.f32 %v1583_v46, %v1053_v32 }
 0x3a2   :  { %v1666_v52 = vsel %vm1054_vm2, %v1204_v47, -inf  ;;  %v1681_v5 = vsel %vm1054_vm2, %v1584_v63, -inf }
 0x3a3   :  { %1667 = vmax.xlane.f32.xlu1 %v1666_v52  ;;  %v1355_v53 = vpop.f32.mrb[6].mxu1 }
 0x3a4   :  { %v1356_v54 = vadd.f32 %v1355_v53, %v1053_v32  ;;  %v3168_v58 = vpop.f32.mrb[7].mxu1 }
 0x3a6   :  { %v1672_v55 = vsel %vm1054_vm2, %v1356_v54, -inf }
 0x3a7   :  { %1673 = vmax.xlane.f32.xlu0 %v1672_v55  ;;  %v1507_v57 = vpop.f32.mrb[8].mxu1 }
 0x3a8   :  { %v1508_v60 = vadd.f32 %v1507_v57, %v1053_v32  ;;  %v3178_v62 = vpop.f32.mrb[9].mxu1 }
 0x3aa   :  { %v1678_v1 = vsel %vm1054_vm2, %v1508_v60, -inf }
 0x3ab   :  { %1676 = vmax.xlane.f32.xlu0 %v1675_v0  ;;  %1679 = vmax.xlane.f32.xlu1 %v1678_v1  ;;  %v1659_v2 = vpop.f32.mrb[10].mxu1 }
 0x3ac   :  { %v1660_v3 = vadd.f32 %v1659_v2, %v1053_v32  ;;  %v3188_v4 = vpop.f32.mrb[11].mxu1 }
 0x3ae   :  { %v1684_v6 = vsel %vm1054_vm2, %v1660_v3, -inf }
 0x3af   :  { %1682 = vmax.xlane.f32.xlu0 %v1681_v5  ;;  %1685 = vmax.xlane.f32.xlu1 %v1684_v6 }
 0x3c0   :  { %219 = vrot.lane.b32.xlu1 %v3563_v37, %s3482_s4 }
 0x3c4   :  { %225 = vrot.lane.b32.xlu1 %v3563_v37, %s3483_s27 }
 0x3c5   :  { %213 = vrot.lane.b32.xlu0 %v3563_v37, %s3484_s30 }
 0x3c8   :  { %231 = vrot.lane.b32.xlu1 %v3563_v37, %s3485_s6 }
 0x3cc   :  { %215 = vrot.lane.b32.xlu1 %v3559_v36, %s3484_s30 }
 0x3d0   :  { %221 = vrot.lane.b32.xlu1 %v3559_v36, %s3482_s4 }
 0x3d4   :  { %227 = vrot.lane.b32.xlu1 %v3559_v36, %s3483_s27 }
 0x3d8   :  { %233 = vrot.lane.b32.xlu1 %v3559_v36, %s3485_s6 }
 0x427   :  { %v1665_v7 = vpop.xlane.xlu0 %1664 }
 0x428   :  { %v1687_v8 = vsub.f32 %v1128_v35, %v1665_v7 }
 0x42a   :  { %v1695_v9 = vmul.f32 1.442695, %v1687_v8 }
 0x42b   :  { %v1671_v10 = vpop.xlane.xlu0 %1670 }
 0x42c   :  { %3378 = vpow2.f32 %v1695_v9  ;;  %v1689_v11 = vsub.f32 %v1280_v41, %v1671_v10 }
 0x42e   :  { %v1699_v12 = vmul.f32 1.442695, %v1689_v11 }
 0x430   :  { %v1668_v17 = vpop.xlane.xlu1 %1667  ;;  %3380 = vpow2.f32 %v1699_v12 }
 0x431   :  { %v1688_v18 = vsub.f32 %v1204_v47, %v1668_v17 }
 0x433   :  { %v1697_v19 = vmul.f32 1.442695, %v1688_v18 }
 0x434   :  { %v1674_v37 = vpop.xlane.xlu0 %1673 }
 0x435   :  { %3382 = vpow2.f32 %v1697_v19  ;;  %v1690_v50 = vsub.f32 %v1356_v54, %v1674_v37 }
 0x436   :  { %v3745_v20 = vpop.eup %3378 }
 0x437   :  { %v1701_v21 = vmul.f32 1.442695, %v1690_v50  ;;  %v1711_v36 = vsel %vm1054_vm2, %v3745_v20, 0.0 }
 0x438   :  { %v1680_v13 = vpop.xlane.xlu1 %1679  ;;  %v1677_v14 = vpop.xlane.xlu0 %1676  ;;  %1712 = vadd.xlane.f32.xlu0 %v1711_v36 }
 0x439   :  { %3384 = vpow2.f32 %v1701_v21  ;;  %v1692_v15 = vsub.f32 %v1508_v60, %v1680_v13  ;;  %v1691_v16 = vsub.f32 %v1432_v59, %v1677_v14 }
 0x43a   :  { %v3749_v22 = vpop.eup %3380 }
 0x43b   :  { %v1705_v23 = vmul.f32 1.442695, %v1692_v15  ;;  %v1703_v24 = vmul.f32 1.442695, %v1691_v16  ;;  %v1717_v25 = vsel %vm1054_vm2, %v3749_v22, 0.0 }
 0x43c   :  { %v1686_v26 = vpop.xlane.xlu1 %1685  ;;  %v1683_v29 = vpop.xlane.xlu0 %1682  ;;  %1718 = vadd.xlane.f32.xlu0 %v1717_v25 }
 0x43d   :  { %3386 = vpow2.f32 %v1705_v23  ;;  %v1694_v30 = vsub.f32 %v1660_v3, %v1686_v26  ;;  %v1693_v27 = vsub.f32 %v1584_v63, %v1683_v29 }
 0x43e   :  { %3388 = vpow2.f32 %v1703_v24 }
 0x43f   :  { %v3753_v28 = vpop.eup %3382  ;;  %v1707_v31 = vmul.f32 1.442695, %v1693_v27  ;;  %v1709_v34 = vmul.f32 1.442695, %v1694_v30 }
 0x440   :  { %v220_v32 = vpop.permute.xlu1 %219  ;;  %v1714_v33 = vsel %vm1054_vm2, %v3753_v28, 0.0  ;;  %v214_v41 = vpop.permute.xlu0 %213 }
 0x441   :  { %1715 = vadd.xlane.f32.xlu1 %v1714_v33  ;;  %3390 = vpow2.f32 %v1707_v31 }
 0x442   :  { %3392 = vpow2.f32 %v1709_v34 }
 0x443   :  { %v3757_v35 = vpop.eup %3384 }
 0x444   :  { %v226_v39 = vpop.permute.xlu1 %225  ;;  %v1720_v40 = vsel %vm1054_vm2, %v3757_v35, 0.0 }
 0x445   :  { %1721 = vadd.xlane.f32.xlu1 %v1720_v40  ;;  %v373_v43 = vcombine.low %v214_v41, %v226_v39  ;;  %v374_v61 = vcombine.high %v214_v41, %v226_v39 }
 0x447   :  { %v3761_v42 = vpop.eup %3386  ;;  %v381_v52 = vrot.slane %v373_v43, %v3583_v49  ;;  %v388_v53 = vrot.slane %v374_v61, %v3583_v49 }
 0x448   :  { %v3763_v44 = vpop.eup %3388  ;;  %v232_v45 = vpop.permute.xlu1 %231  ;;  %v1726_v46 = vsel %vm1054_vm2, %v3761_v42, 0.0 }
 0x449   :  { %v389_v47 = vcombine.low %v220_v32, %v232_v45  ;;  %v390_v48 = vcombine.high %v220_v32, %v232_v45  ;;  %1727 = vadd.xlane.f32.xlu1 %v1726_v46  ;;  %v1723_v51 = vsel %vm1054_vm2, %v3763_v44, 0.0 }
 0x44a   :  { %1724 = vadd.xlane.f32.xlu0 %v1723_v51 }
 0x44b   :  { %v397_v54 = vrot.slane %v389_v47, %v3583_v49  ;;  %v404_v58 = vrot.slane %v390_v48, %v3583_v49  ;;  %v3773_v59 = vpop.eup %3390 }
 0x44c   :  { %v216_v55 = vpop.permute.xlu1 %215  ;;  %v1729_v0 = vsel %vm1054_vm2, %v3773_v59, 0.0  ;;  %v3777_v1 = vpop.eup %3392 }
 0x44d   :  { %v405_v57 = vcombine.low %v381_v52, %v397_v54  ;;  %v406_v60 = vcombine.high %v381_v52, %v397_v54  ;;  %v421_v62 = vcombine.low %v388_v53, %v404_v58  ;;  %v422_v63 = vcombine.high %v388_v53, %v404_v58 }
 0x44e   :  { %1730 = vadd.xlane.f32.xlu0 %v1729_v0  ;;  %v1732_v11 = vsel %vm1054_vm2, %v3777_v1, 0.0 }
 0x44f   :  { %v413_v2 = vrot.slane %v405_v57, %v3585_v56  ;;  %v420_v3 = vrot.slane %v406_v60, %v3585_v56  ;;  %v429_v4 = vrot.slane %v421_v62, %v3585_v56  ;;  %v436_v5 = vrot.slane %v422_v63, %v3585_v56 }
 0x450   :  { %v222_v6 = vpop.permute.xlu1 %221 }
 0x451   :  { %v917_v7 = vcombine.low %v413_v2, %v420_v3  ;;  %v3029_v8 = vcombine.high %v413_v2, %v420_v3  ;;  %v933_v9 = vcombine.low %v429_v4, %v436_v5  ;;  %v3030_v10 = vcombine.high %v429_v4, %v436_v5 }
 0x452   :  { %1733 = vadd.xlane.f32.xlu0 %v1732_v11 }
 0x453   :  { %v924_v12 = vrot.slane %v917_v7, %v3583_v49  ;;  %v932_v17 = vrot.slane %v3029_v8, %v3583_v49  ;;  %v940_v18 = vrot.slane %v933_v9, %v3583_v49  ;;  %v948_v19 = vrot.slane %v3030_v10, %v3583_v49 }
 0x454   :  { %v228_v37 = vpop.permute.xlu1 %227 }
 0x455   :  { %v949_v50 = vcombine.low %v924_v12, %v932_v17  ;;  %v965_v21 = vcombine.low %v940_v18, %v948_v19  ;;  %v950_v36 = vcombine.high %v924_v12, %v932_v17  ;;  %v966_v13 = vcombine.high %v940_v18, %v948_v19 }
 0x456   :  { %v577_v14 = vcombine.low %v216_v55, %v228_v37  ;;  %v578_v15 = vcombine.high %v216_v55, %v228_v37 }
 0x457   :  { %v957_v16 = vrot.slane %v949_v50, %v3585_v56  ;;  %v973_v23 = vrot.slane %v965_v21, %v3585_v56  ;;  %v3792_v25 = vrot.slane %v950_v36, %v3585_v56  ;;  %v3795_v26 = vrot.slane %v966_v13, %v3585_v56 }
 0x458   :  { %v234_v24 = vpop.permute.xlu1 %233  ;;  %v585_v34 = vrot.slane %v577_v14, %v3583_v49  ;;  %v592_v39 = vrot.slane %v578_v15, %v3583_v49 }
 0x459   :  { %v593_v29 = vcombine.low %v222_v6, %v234_v24  ;;  %v594_v30 = vcombine.high %v222_v6, %v234_v24  ;;  %v981_v27 = vcombine.low %v957_v16, %v973_v23  ;;  %v982_v31 = vcombine.high %v957_v16, %v973_v23 }
 0x45a   :  { %v983_v32 = vcombine.low %v3792_v25, %v3795_v26  ;;  %v984_v33 = vcombine.high %v3792_v25, %v3795_v26  ;;  %v2639_v25 = vld [vmem:[%s4013_s1] sm:$0xff]  ;;  %v2640_v26 = vld [vmem:[%s4013_s1 + $0x10] sm:$0xff] }
 0x45b   :  { %v601_v40 = vrot.slane %v593_v29, %v3583_v49  ;;  %v608_v41 = vrot.slane %v594_v30, %v3583_v49  ;;  %3190 = vmatpush3.msra.mxu0 %v981_v27 }
 0x45c   :  { %3199 = vmatprep.subr.mxu0 %v3478_v38 }
 0x45d   :  { %v609_v43 = vcombine.low %v585_v34, %v601_v40  ;;  %v610_v61 = vcombine.high %v585_v34, %v601_v40  ;;  %v625_v45 = vcombine.low %v592_v39, %v608_v41  ;;  %v626_v46 = vcombine.high %v592_v39, %v608_v41 }
 0x45f   :  { %v617_v47 = vrot.slane %v609_v43, %v3585_v56  ;;  %v624_v48 = vrot.slane %v610_v61, %v3585_v56  ;;  %v633_v51 = vrot.slane %v625_v45, %v3585_v56  ;;  %v640_v52 = vrot.slane %v626_v46, %v3585_v56 }
 0x461   :  { %v985_v53 = vcombine.low %v617_v47, %v624_v48  ;;  %v3031_v54 = vcombine.high %v617_v47, %v624_v48  ;;  %v1001_v58 = vcombine.low %v633_v51, %v640_v52  ;;  %v3032_v55 = vcombine.high %v633_v51, %v640_v52 }
 0x463   :  { %v992_v57 = vrot.slane %v985_v53, %v3583_v49  ;;  %v1000_v60 = vrot.slane %v3031_v54, %v3583_v49  ;;  %v1008_v62 = vrot.slane %v1001_v58, %v3583_v49  ;;  %v1016_v63 = vrot.slane %v3032_v55, %v3583_v49 }
 0x465   :  { %v1017_v0 = vcombine.low %v992_v57, %v1000_v60  ;;  %v1033_v2 = vcombine.low %v1008_v62, %v1016_v63  ;;  %v1018_v3 = vcombine.high %v992_v57, %v1000_v60  ;;  %v1034_v4 = vcombine.high %v1008_v62, %v1016_v63 }
 0x467   :  { %v1025_v5 = vrot.slane %v1017_v0, %v3585_v56  ;;  %v1041_v6 = vrot.slane %v1033_v2, %v3585_v56  ;;  %v1032_v7 = vrot.slane %v1018_v3, %v3585_v56  ;;  %v1048_v8 = vrot.slane %v1034_v4, %v3585_v56 }
 0x469   :  { %v1049_v9 = vcombine.low %v1025_v5, %v1041_v6  ;;  %v1050_v10 = vcombine.high %v1025_v5, %v1041_v6  ;;  %v1051_v11 = vcombine.low %v1032_v7, %v1048_v8  ;;  %v1052_v12 = vcombine.high %v1032_v7, %v1048_v8 }
 0x46b   :  { %3195 = vmatpush3.msra.mxu1 %v1049_v9 }
 0x46c   :  { %3204 = vmatprep.subr.mxu1 %v3478_v38 }
 0x4c5   :  { %v1713_v17 = vpop.xlane.xlu0 %1712 }
 0x4c6   :  { %3394 = vrcp.f32 %v1713_v17 }
 0x4c9   :  { %v1719_v18 = vpop.xlane.xlu0 %1718 }
 0x4ca   :  { %3396 = vrcp.f32 %v1719_v18 }
 0x4ce   :  { %v1716_v19 = vpop.xlane.xlu1 %1715 }
 0x4cf   :  { %3398 = vrcp.f32 %v1716_v19 }
 0x4d0   :  { %v3395_v37 = vpop.eup %3394 }
 0x4d1   :  { %v1743_v50 = vmul.f32 %v3395_v37, %v3745_v20 }
 0x4d2   :  { %v1722_v21 = vpop.xlane.xlu1 %1721 }
 0x4d3   :  { %3400 = vrcp.f32 %v1722_v21  ;;  %3192 = vmatmul.mubr.msk.f32.vlgmr.msra.gmra.mrb[6].mxu0 %vm1054_vm2, %v1743_v50 }
 0x4d4   :  { %v3397_v36 = vpop.eup %3396  ;;  %3200 = vmatpush3.msra.mxu0 %v982_v31  ;;  %3201 = vmatprep.mubr.msk.f32.mxu0 %vm3479_vm1, %v3478_v38 }
 0x4d5   :  { %v1745_v13 = vmul.f32 %v3397_v36, %v3749_v22  ;;  %3209 = vmatprep.subr.mxu0 %v3478_v38 }
 0x4d6   :  { %v1728_v14 = vpop.xlane.xlu1 %1727 }
 0x4d7   :  { %3402 = vrcp.f32 %v1728_v14  ;;  %v1725_v15 = vpop.xlane.xlu0 %1724  ;;  %3202 = vmatmul.mubr.msk.f32.vlgmr.msra.gmra.mrb[8].mxu0 %vm1054_vm2, %v1745_v13 }
 0x4d8   :  { %3404 = vrcp.f32 %v1725_v15  ;;  %3210 = vmatpush3.msra.mxu0 %v983_v32  ;;  %3211 = vmatprep.mubr.msk.f32.mxu0 %vm3479_vm1, %v3478_v38 }
 0x4d9   :  { %v3399_v20 = vpop.eup %3398  ;;  %3219 = vmatprep.subr.mxu0 %v3478_v38 }
 0x4da   :  { %v1744_v16 = vmul.f32 %v3399_v20, %v3753_v28 }
 0x4db   :  { %v1731_v23 = vpop.xlane.xlu0 %1730 }
 0x4dc   :  { %3197 = vmatmul.mubr.msk.f32.vlgmr.msra.gmra.mrb[12].mxu1 %vm1054_vm2, %v1744_v16  ;;  %3406 = vrcp.f32 %v1731_v23 }
 0x4dd   :  { %v3401_v22 = vpop.eup %3400  ;;  %3205 = vmatpush3.msra.mxu1 %v1050_v10  ;;  %3206 = vmatprep.mubr.msk.f32.mxu1 %vm3479_vm1, %v3478_v38 }
 0x4de   :  { %v1746_v24 = vmul.f32 %v3401_v22, %v3757_v35  ;;  %3214 = vmatprep.subr.mxu1 %v3478_v38 }
 0x4df   :  { %v1734_v29 = vpop.xlane.xlu0 %1733 }
 0x4e0   :  { %3207 = vmatmul.mubr.msk.f32.vlgmr.msra.gmra.mrb[14].mxu1 %vm1054_vm2, %v1746_v24  ;;  %3408 = vrcp.f32 %v1734_v29 }
 0x4e1   :  { %v3403_v30 = vpop.eup %3402  ;;  %3215 = vmatpush3.msra.mxu1 %v1051_v11  ;;  %3216 = vmatprep.mubr.msk.f32.mxu1 %vm3479_vm1, %v3478_v38 }
 0x4e2   :  { %v3405_v28 = vpop.eup %3404  ;;  %v1748_v27 = vmul.f32 %v3403_v30, %v3761_v42  ;;  %3224 = vmatprep.subr.mxu1 %v3478_v38 }
 0x4e3   :  { %v1747_v31 = vmul.f32 %v3405_v28, %v3763_v44 }
 0x4e4   :  { %3217 = vmatmul.mubr.msk.f32.vlgmr.msra.gmra.mrb[16].mxu1 %vm1054_vm2, %v1748_v27 }
 0x4e5   :  { %3212 = vmatmul.mubr.msk.f32.vlgmr.msra.gmra.mrb[10].mxu0 %vm1054_vm2, %v1747_v31  ;;  %3225 = vmatpush3.msra.mxu1 %v1052_v12 }
 0x4e6   :  { %3220 = vmatpush3.msra.mxu0 %v984_v33  ;;  %3221 = vmatprep.mubr.msk.f32.mxu0 %vm3479_vm1, %v3478_v38  ;;  %v3407_v35 = vpop.eup %3406  ;;  %v3364_v33 = vpack.i.bf16 %v2640_v26, %v2639_v25 }
 0x4e7   :  { %3226 = vmatprep.mubr.msk.f32.mxu1 %vm3479_vm1, %v3478_v38  ;;  %v1749_v42 = vmul.f32 %v3407_v35, %v3773_v59  ;;  %v2641_v38 = vld [vmem:[%s4013_s1 + $0x20] sm:$0xff]  ;;  %v2642_v59 = vld [vmem:[%s4013_s1 + $0x30] sm:$0xff] }
 0x4e8   :  { %3365 = vrot.lane.b32.xlu0 %v3364_v33, %s3486_s14 }
 0x4e9   :  { %3222 = vmatmul.mubr.msk.f32.vlgmr.msra.gmra.mrb[12].mxu0 %vm1054_vm2, %v1749_v42 }
 0x4ea   :  { %v3409_v44 = vpop.eup %3408 }
 0x4eb   :  { %v1750_v32 = vmul.f32 %v3409_v44, %v3777_v1  ;;  %v3369_v1 = vpack.i.bf16 %v2642_v59, %v2641_v38 }
 0x4ed   :  { %3227 = vmatmul.mubr.msk.f32.vlgmr.msra.gmra.mrb[18].mxu1 %vm1054_vm2, %v1750_v32  ;;  %3370 = vrot.lane.b32.xlu1 %v3369_v1, %s3486_s14  ;;  %s3489_s14 = smov [#allocation5]  }
 0x55a   :  { %v3366_v0 = vpop.permute.xlu0 %3365 }
 0x55b   :  { %v3368_v2 = vunpack.i.h.bf16 %v3366_v0  ;;  %v3367_v3 = vunpack.i.l.bf16 %v3366_v0 }
 0x55d   :  { %v3294_v10 = vpack.c.bf16 %v3368_v2, %v3367_v3 }
 0x55f   :  { %v3371_v8 = vpop.permute.xlu1 %3370  ;;  %3295 = vmatprep.subr.bf16.mxu1 %v3294_v10 }
 0x560   :  { %v3373_v11 = vunpack.i.h.bf16 %v3371_v8  ;;  %v3372_v12 = vunpack.i.l.bf16 %v3371_v8  ;;  %3297 = vmatpush3.bf16.msra.mxu1 %v3294_v10 }
 0x562   :  { %v3298_v13 = vpack.c.bf16 %v3373_v11, %v3372_v12 }
 0x564   :  { %3299 = vmatprep.subr.bf16.mxu1 %v3298_v13 }
 0x565   :  { %3301 = vmatpush3.bf16.msra.mxu1 %v3298_v13 }
 0x5a6   :  { %v1820_v34 = vpop.f32.mrb[6].mxu0 }
 0x5a7   :  { %v3193_v39 = vpop.f32.mrb[7].mxu0 }
 0x5aa   :  { %v1966_v40 = vpop.f32.mrb[8].mxu0 }
 0x5ab   :  { %v3203_v41 = vpop.f32.mrb[9].mxu0 }
 0x5af   :  { %v1893_v43 = vpop.f32.mrb[12].mxu1 }
 0x5b0   :  { %v3198_v61 = vpop.f32.mrb[13].mxu1 }
 0x5b3   :  { %v2039_v45 = vpop.f32.mrb[14].mxu1 }
 0x5b4   :  { %v3208_v46 = vpop.f32.mrb[15].mxu1 }
 0x5b7   :  { %v2185_v47 = vpop.f32.mrb[16].mxu1 }
 0x5b8   :  { %v2112_v48 = vpop.f32.mrb[10].mxu0  ;;  %v2403_v51 = vcombine.low %v1893_v43, %v2185_v47  ;;  %v2404_v52 = vcombine.high %v1893_v43, %v2185_v47  ;;  %v3218_v53 = vpop.f32.mrb[17].mxu1 }
 0x5b9   :  { %v2335_v54 = vcombine.low %v1820_v34, %v2112_v48  ;;  %v2336_v58 = vcombine.high %v1820_v34, %v2112_v48  ;;  %v3213_v55 = vpop.f32.mrb[11].mxu0 }
 0x5ba   :  { %v2411_v23 = vrot.slane %v2403_v51, %v3583_v49  ;;  %v2418_v22 = vrot.slane %v2404_v52, %v3583_v49 }
 0x5bb   :  { %v2343_v4 = vrot.slane %v2335_v54, %v3583_v49  ;;  %v2350_v5 = vrot.slane %v2336_v58, %v3583_v49 }
 0x5bc   :  { %v2258_v57 = vpop.f32.mrb[12].mxu0 }
 0x5bd   :  { %v2351_v60 = vcombine.low %v1966_v40, %v2258_v57  ;;  %v2352_v62 = vcombine.high %v1966_v40, %v2258_v57  ;;  %v3223_v63 = vpop.f32.mrb[13].mxu0 }
 0x5bf   :  { %v2359_v6 = vrot.slane %v2351_v60, %v3583_v49  ;;  %v2366_v7 = vrot.slane %v2352_v62, %v3583_v49 }
 0x5c0   :  { %v2331_v9 = vpop.f32.mrb[18].mxu1 }
 0x5c1   :  { %v2367_v17 = vcombine.low %v2343_v4, %v2359_v6  ;;  %v2368_v18 = vcombine.high %v2343_v4, %v2359_v6  ;;  %v2383_v19 = vcombine.low %v2350_v5, %v2366_v7  ;;  %v2384_v37 = vcombine.high %v2350_v5, %v2366_v7  ;;  %v3228_v50 = vpop.f32.mrb[19].mxu1 }
 0x5c2   :  { %v2419_v21 = vcombine.low %v2039_v45, %v2331_v9  ;;  %v2420_v36 = vcombine.high %v2039_v45, %v2331_v9 }
 0x5c3   :  { %v2375_v14 = vrot.slane %v2367_v17, %v3585_v56  ;;  %v2382_v15 = vrot.slane %v2368_v18, %v3585_v56  ;;  %v2391_v20 = vrot.slane %v2383_v19, %v3585_v56  ;;  %v2398_v16 = vrot.slane %v2384_v37, %v3585_v56 }
 0x5c4   :  { %v2427_v24 = vrot.slane %v2419_v21, %v3583_v49  ;;  %v2434_v29 = vrot.slane %v2420_v36, %v3583_v49 }
 0x5c5   :  { %v2471_v30 = vcombine.low %v2375_v14, %v2382_v15  ;;  %v3057_v28 = vcombine.high %v2375_v14, %v2382_v15  ;;  %v2487_v27 = vcombine.low %v2391_v20, %v2398_v16  ;;  %v3058_v31 = vcombine.high %v2391_v20, %v2398_v16 }
 0x5c6   :  { %v2435_v35 = vcombine.low %v2411_v23, %v2427_v24  ;;  %v2436_v42 = vcombine.high %v2411_v23, %v2427_v24  ;;  %v2451_v44 = vcombine.low %v2418_v22, %v2434_v29  ;;  %v2452_v32 = vcombine.high %v2418_v22, %v2434_v29  ;;  %v3061_v23 = vld [vmem:[%s4015_s3 + $0x2] ss:$0 sm:$0xff] }
 0x5c7   :  { %v2478_v25 = vrot.slane %v2471_v30, %v3583_v49  ;;  %v2486_v26 = vrot.slane %v3057_v28, %v3583_v49  ;;  %v2494_v33 = vrot.slane %v2487_v27, %v3583_v49  ;;  %v2502_v38 = vrot.slane %v3058_v31, %v3583_v49  ;;  %v3418_v28 = vld [vmem:[#allocation2 + $0x8] sm:$0xff]  ;;  %v3419_v31 = vld [vmem:[#allocation2] sm:$0xff] }
 0x5c8   :  { %v2443_v59 = vrot.slane %v2435_v35, %v3585_v56  ;;  %v2450_v1 = vrot.slane %v2436_v42, %v3585_v56  ;;  %v2459_v34 = vrot.slane %v2451_v44, %v3585_v56  ;;  %v2466_v39 = vrot.slane %v2452_v32, %v3585_v56 }
 0x5c9   :  { %v2503_v40 = vcombine.low %v2478_v25, %v2486_v26  ;;  %v2519_v41 = vcombine.low %v2494_v33, %v2502_v38  ;;  %v2504_v43 = vcombine.high %v2478_v25, %v2486_v26  ;;  %v2520_v61 = vcombine.high %v2494_v33, %v2502_v38 }
 0x5ca   :  { %v2539_v45 = vcombine.low %v2443_v59, %v2450_v1  ;;  %v3059_v46 = vcombine.high %v2443_v59, %v2450_v1  ;;  %v2555_v47 = vcombine.low %v2459_v34, %v2466_v39  ;;  %v3060_v48 = vcombine.high %v2459_v34, %v2466_v39 }
 0x5cb   :  { %v2511_v51 = vrot.slane %v2503_v40, %v3585_v56  ;;  %v2527_v52 = vrot.slane %v2519_v41, %v3585_v56  ;;  %v2518_v53 = vrot.slane %v2504_v43, %v3585_v56  ;;  %v2534_v54 = vrot.slane %v2520_v61, %v3585_v56  ;;  %v2784_v41 = vld [vmem:[%s4013_s1 + $0x8] sm:$0xff]  ;;  %v2785_v43 = vld [vmem:[%s4013_s1 + $0x18] sm:$0xff] }
 0x5cc   :  { %v2546_v58 = vrot.slane %v2539_v45, %v3583_v49  ;;  %v2554_v55 = vrot.slane %v3059_v46, %v3583_v49  ;;  %v2562_v57 = vrot.slane %v2555_v47, %v3583_v49  ;;  %v2570_v60 = vrot.slane %v3060_v48, %v3583_v49  ;;  %v2786_v45 = vld [vmem:[%s4013_s1 + $0x28] sm:$0xff]  ;;  %v2787_v46 = vld [vmem:[%s4013_s1 + $0x38] sm:$0xff]  ;;  %v2891_v48 = vld [vmem:[%s4014_s2] sm:$0xff] }
 0x5cd   :  { %v2536_v62 = vcombine.high %v2511_v51, %v2527_v52  ;;  %v2535_v63 = vcombine.low %v2511_v51, %v2527_v52  ;;  %v2537_v0 = vcombine.low %v2518_v53, %v2534_v54  ;;  %v2538_v2 = vcombine.high %v2518_v53, %v2534_v54  ;;  %v2892_v51 = vld [vmem:[%s4014_s2 + $0x8] sm:$0xff] }
 0x5ce   :  { %v2572_v3 = vcombine.high %v2546_v58, %v2554_v55  ;;  %v2588_v4 = vcombine.high %v2562_v57, %v2570_v60  ;;  %v2571_v5 = vcombine.low %v2546_v58, %v2554_v55  ;;  %v2587_v6 = vcombine.low %v2562_v57, %v2570_v60 }
 0x5cf   :  { %2609 = vrot.lane.b32.xlu0 %v2536_v62, %s3470_s29  ;;  %v3302_v61 = vpack.c.bf16 %v2785_v43, %v2784_v41  ;;  %v3306_v47 = vpack.c.bf16 %v2787_v46, %v2786_v45  ;;  %v3310_v52 = vpack.c.bf16 %v2892_v51, %v2891_v48  ;;  %v3069_v51 = vld [vmem:[%s4015_s3 + $0x5] ss:$0 sm:$0xff] }
 0x5d0   :  { %v2586_v7 = vrot.slane %v2572_v3, %v3585_v56  ;;  %v2602_v8 = vrot.slane %v2588_v4, %v3585_v56  ;;  %v2579_v9 = vrot.slane %v2571_v5, %v3585_v56  ;;  %v2595_v10 = vrot.slane %v2587_v6, %v3585_v56 }
 0x5d1   :  { %3303 = vmatprep.subr.bf16.mxu1 %v3302_v61  ;;  %3311 = vmatprep.subr.bf16.mxu0 %v3310_v52 }
 0x5d2   :  { %v2605_v11 = vcombine.low %v2586_v7, %v2602_v8  ;;  %v2606_v49 = vcombine.high %v2586_v7, %v2602_v8  ;;  %v2604_v12 = vcombine.high %v2579_v9, %v2595_v10  ;;  %v2603_v17 = vcombine.low %v2579_v9, %v2595_v10  ;;  %3313 = vmatpush3.bf16.msra.mxu0 %v3310_v52  ;;  %v2893_v9 = vld [vmem:[%s4014_s2 + $0x10] sm:$0xff]  ;;  %v2894_v10 = vld [vmem:[%s4014_s2 + $0x18] sm:$0xff] }
 0x5d3   :  { %2617 = vrot.lane.b32.xlu0 %v2537_v0, %s3487_s15 }
 0x5d4   :  { %2619 = vrot.lane.b32.xlu1 %v2605_v11, %s3487_s15  ;;  %v3314_v11 = vpack.c.bf16 %v2894_v10, %v2893_v9  ;;  %s2997_s15 = sshll.u32 %s3489_s14, 4  ;;  %s2998_s15 = int_to_ptr.vmem [resolvable:$true] %s2997_s15 }
 0x5d5   :  { %p3447_p9 = scmp.lt.s32.totalorder %s2998_s15, %s2998_s15 }
 0x5d6   :  { %3315 = vmatprep.subr.bf16.mxu0 %v3314_v11 }
 0x5d7   :  { %2611 = vrot.lane.b32.xlu0 %v2604_v12, %s3470_s29  ;;  %3317 = vmatpush3.bf16.msra.mxu0 %v3314_v11  ;;  %v2896_v12 = vld [vmem:[%s4014_s2 + $0x28] sm:$0xff] }
 0x5d8   :  { %2627 = vrot.lane.b32.xlu1 %v2606_v49, %s3488_s16  ;;  %v2895_v49 = vld [vmem:[%s4014_s2 + $0x20] sm:$0xff] }
 0x5db   :  { %2625 = vrot.lane.b32.xlu0 %v2538_v2, %s3488_s16  ;;  %v3065_v2 = vld [vmem:[%s4015_s3 + $0x4] ss:$0 sm:$0xff]  ;;  %s3442_s16 = scalar_lea.vmem %s2998_s15, 256 }
 0x5dc   :  { %p3443_p8 = scmp.ne.s32.totalorder %s2998_s15, %s3442_s16  ;;  %p3448_p10 = scmp.lt.s32.totalorder %s3442_s16, %s3442_s16 }
 0x5de   :  { %p3449_p11 = por %p3448_p10, %p3447_p9 }
 0x5e0   :  { %p3450_p12 = pnand %p3449_p11, %p3443_p8 }
 0x641   :  { %v2610_v18 = vpop.permute.xlu0 %2609 }
 0x642   :  { %v2631_v56 = vsel %vm1054_vm2, %v2535_v63, %v2610_v18  ;;  %v3064_v63 = vld [vmem:[%s4015_s3 + $0x3] ss:$0 sm:$0xff]  ;;  %v2897_v18 = vld [vmem:[%s4014_s2 + $0x30] sm:$0xff] }
 0x645   :  { %v2618_v19 = vpop.permute.xlu0 %2617 }
 0x646   :  { %v2620_v37 = vpop.permute.xlu1 %2619  ;;  %v2634_v13 = vsel %vm2633_vm3, %v2631_v56, %v2618_v19  ;;  %v2898_v19 = vld [vmem:[%s4014_s2 + $0x38] sm:$0xff] }
 0x649   :  { %v2612_v50 = vpop.permute.xlu0 %2611 }
 0x64a   :  { %v2632_v21 = vsel %vm1054_vm2, %v2603_v17, %v2612_v50  ;;  %v2628_v15 = vpop.permute.xlu1 %2627  ;;  %v3318_v17 = vpack.c.bf16 %v2896_v12, %v2895_v49  ;;  %v2899_v50 = vld [vmem:[%s4014_s2 + $0x40] sm:$0xff] }
 0x64b   :  { %v2635_v36 = vsel %vm2633_vm3, %v2632_v21, %v2620_v37  ;;  %v3322_v37 = vpack.c.bf16 %v2898_v19, %v2897_v18  ;;  %v2900_v21 = vld [vmem:[%s4014_s2 + $0x48] sm:$0xff] }
 0x64c   :  { %v2638_v16 = vsel %vm2636_vm4, %v2635_v36, %v2628_v15  ;;  %3319 = vmatprep.subr.bf16.mxu0 %v3318_v17  ;;  %v3326_v56 = vpack.c.bf16 %v2900_v21, %v2899_v50  ;;  %v2901_v36 = vld [vmem:[%s4014_s2 + $0x50] sm:$0xff]  ;;  %v2903_v15 = vld [vmem:[%s4014_s2 + $0x60] sm:$0xff] }
 0x64d   :  { %v2626_v14 = vpop.permute.xlu0 %2625  ;;  %3321 = vmatpush3.bf16.msra.mxu0 %v3318_v17 }
 0x64e   :  { %v2637_v20 = vsel %vm2636_vm4, %v2634_v13, %v2626_v14  ;;  %v2902_v13 = vld [vmem:[%s4014_s2 + $0x58] sm:$0xff]  ;;  %3323 = vmatprep.subr.bf16.mxu0 %v3322_v37 }
 0x64f   :  { %3237 = vmatprep.mubr.msk.f32.mxu1 %vm44_vm0, %v2637_v20  ;;  %v3330_v14 = vpack.c.bf16 %v2902_v13, %v2901_v36  ;;  %v2904_v20 = vld [vmem:[%s4014_s2 + $0x68] sm:$0xff] }
 0x650   :  { %3238 = vmatmul.mubr.msk.f32.vlgmr.msra.gmra.mrb[20].mxu1 %vm44_vm0, %v2638_v16  ;;  %v3334_v16 = vpack.c.bf16 %v2904_v20, %v2903_v15 }
 0x651   :  { %3305 = vmatpush3.bf16.msra.mxu1 %v3302_v61  ;;  %3325 = vmatpush3.bf16.msra.mxu0 %v3322_v37 }
 0x652   :  { %3307 = vmatprep.subr.bf16.mxu1 %v3306_v47  ;;  %3327 = vmatprep.subr.bf16.mxu0 %v3326_v56 }
 0x655   :  { %3309 = vmatpush3.bf16.msra.mxu1 %v3306_v47  ;;  %3329 = vmatpush3.bf16.msra.mxu0 %v3326_v56 }
 0x656   :  { %3331 = vmatprep.subr.bf16.mxu0 %v3330_v14 }
 0x659   :  { %3333 = vmatpush3.bf16.msra.mxu0 %v3330_v14 }
 0x65a   :  { %3335 = vmatprep.subr.bf16.mxu0 %v3334_v16 }
 0x65d   :  { %3337 = vmatpush3.bf16.msra.mxu0 %v3334_v16 }
 0x723   :  { %v3239_v22 = vpop.f32.mrb[20].mxu1 }
 0x724   :  { %v2741_v24 = vadd.f32 %v3239_v22, %v3061_v23  ;;  %v2735_v29 = vpop.f32.mrb[21].mxu1  ;;  %v2906_v22 = vld [vmem:[%s4014_s2 + $0x78] sm:$0xff] }
 0x725   :  { %v2736_v30 = vadd.f32 %v3061_v23, %v2735_v29  ;;  %v2905_v23 = vld [vmem:[%s4014_s2 + $0x70] sm:$0xff]  ;;  %v3066_v29 = vld [vmem:[%s4015_s3 + $0x6] ss:$0 sm:$0xff] }
 0x726   :  { %v3907_v27 = vadd.f32 %v3418_v28, %v2741_v24  ;;  %v3338_v24 = vpack.c.bf16 %v2906_v22, %v2905_v23 }
 0x727   :  { %v3909_v35 = vadd.f32 %v3419_v31, %v2736_v30 }
 0x728   :  { %v2749_v42 = vsel %vm44_vm0, %v3907_v27, 0.0  ;;  %3339 = vmatprep.subr.bf16.mxu0 %v3338_v24 }
 0x729   :  { %2750 = vadd.xlane.f32.xlu1 %v2749_v42  ;;  %v2746_v44 = vsel %vm44_vm0, %v3909_v35, 0.0  ;;  %3341 = vmatpush3.bf16.msra.mxu0 %v3338_v24 }
 0x72a   :  { %2747 = vadd.xlane.f32.xlu0 %v2746_v44 }
 0x7b6   :  { %v2751_v32 = vpop.xlane.xlu1 %2750 }
 0x7b7   :  { %v2753_v25 = vmul.f32 0.03125, %v2751_v32  ;;  %v2748_v26 = vpop.xlane.xlu0 %2747 }
 0x7b8   :  { %v2752_v33 = vmul.f32 0.03125, %v2748_v26 }
 0x7b9   :  { %v2755_v38 = vsub.f32 %v3907_v27, %v2753_v25 }
 0x7ba   :  { %v2754_v59 = vsub.f32 %v3909_v35, %v2752_v33 }
 0x7bb   :  { %v2757_v39 = vmul.f32 %v2755_v38, %v2755_v38 }
 0x7bc   :  { %v2756_v1 = vmul.f32 %v2754_v59, %v2754_v59 }
 0x7bd   :  { %v2761_v40 = vsel %vm44_vm0, %v2757_v39, 0.0 }
 0x7be   :  { %v2758_v34 = vsel %vm44_vm0, %v2756_v1, 0.0 }
 0x7bf   :  { %2759 = vadd.xlane.f32.xlu0 %v2758_v34 }
 0x7c3   :  { %2762 = vadd.xlane.f32.xlu0 %v2761_v40 }
 0x84c   :  { %v2760_v53 = vpop.xlane.xlu0 %2759 }
 0x84d   :  { %v2764_v54 = vmul.f32 0.03125, %v2760_v53 }
 0x84f   :  { %v2766_v58 = vadd.f32 1e-05, %v2764_v54 }
 0x850   :  { %v2763_v55 = vpop.xlane.xlu0 %2762 }
 0x851   :  { %3410 = vrsqrt.f32 %v2766_v58  ;;  %v2765_v57 = vmul.f32 0.03125, %v2763_v55 }
 0x853   :  { %v2767_v60 = vadd.f32 1e-05, %v2765_v57 }
 0x855   :  { %3412 = vrsqrt.f32 %v2767_v60 }
 0x85b   :  { %v3411_v62 = vpop.eup %3410 }
 0x85c   :  { %v2770_v0 = vmul.f32 %v3411_v62, %v2754_v59 }
 0x85e   :  { %v2776_v3 = vmul.f32 %v3064_v63, %v2770_v0 }
 0x85f   :  { %v3413_v4 = vpop.eup %3412 }
 0x860   :  { %v2771_v5 = vmul.f32 %v3413_v4, %v2755_v38  ;;  %v2782_v6 = vadd.f32 %v3065_v2, %v2776_v3 }
 0x862   :  { %v2777_v7 = vmul.f32 %v3064_v63, %v2771_v5  ;;  %3248 = vmatprep.mubr.msk.f32.mxu1 %vm44_vm0, %v2782_v6 }
 0x864   :  { %v2783_v8 = vadd.f32 %v3065_v2, %v2777_v7 }
 0x866   :  { %3249 = vmatmul.mubr.msk.f32.vlgmr.msra.gmra.mrb[22].mxu1 %vm44_vm0, %v2783_v8 }
 0x939   :  { %v3250_v30 = vpop.f32.mrb[22].mxu1 }
 0x93a   :  { %v2870_v28 = vadd.f32 %v3250_v30, %v3066_v29  ;;  %v2864_v31 = vpop.f32.mrb[23].mxu1 }
 0x93b   :  { %v2865_v42 = vadd.f32 %v3066_v29, %v2864_v31 }
 0x93c   :  { %v2876_v44 = vmul.f32 0.044715, %v2870_v28  ;;  %v2874_v46 = vmul.f32 0.5, %v2870_v28 }
 0x93d   :  { %v2875_v32 = vmul.f32 0.044715, %v2865_v42  ;;  %v2873_v61 = vmul.f32 0.5, %v2865_v42 }
 0x93e   :  { %v2878_v25 = vmul.f32 %v2876_v44, %v2870_v28 }
 0x93f   :  { %v2877_v26 = vmul.f32 %v2875_v32, %v2865_v42 }
 0x940   :  { %v2880_v33 = vmul.f32 %v2878_v25, %v2870_v28 }
 0x941   :  { %v2879_v38 = vmul.f32 %v2877_v26, %v2865_v42 }
 0x942   :  { %v2882_v59 = vadd.f32 %v2880_v33, %v2870_v28 }
 0x943   :  { %v2881_v1 = vadd.f32 %v2879_v38, %v2865_v42 }
 0x944   :  { %v2884_v34 = vmul.f32 0.7978846, %v2882_v59 }
 0x945   :  { %v2883_v39 = vmul.f32 0.7978846, %v2881_v1 }
 0x946   :  { %3414 = vtanh.f32 %v2884_v34 }
 0x947   :  { %3416 = vtanh.f32 %v2883_v39 }
 0x950   :  { %v3415_v40 = vpop.eup %3414 }
 0x951   :  { %v3417_v41 = vpop.eup %3416  ;;  %v2888_v43 = vadd.f32 1.0, %v3415_v40 }
 0x952   :  { %v2887_v45 = vadd.f32 1.0, %v3417_v41 }
 0x953   :  { %v2890_v48 = vmul.f32 %v2888_v43, %v2874_v46 }
 0x954   :  { %v2889_v47 = vmul.f32 %v2887_v45, %v2873_v61 }
 0x956   :  { %3283 = vmatprep.mubr.f32.mxu0 %v2889_v47 }
 0x957   :  { %3284 = vmatmul.mubr.f32.vlgmr.msra.gmra.mrb[14].mxu0 %v2890_v48 }
 0xa2a   :  { %v3285_v52 = vpop.f32.mrb[14].mxu0 }
 0xa2b   :  { %v2983_v53 = vadd.f32 %v3285_v52, %v3907_v27  ;;  %v2973_v54 = vpop.f32.mrb[15].mxu0 }
 0xa2c   :  { %v2982_v58 = vadd.f32 %v2973_v54, %v3909_v35 }
 0xa2d   :  { %v2989_v55 = vadd.f32 %v3069_v51, %v2983_v53 }
 0xa2e   :  { %v2988_v57 = vadd.f32 %v3069_v51, %v2982_v58 }
 0xa2f   :  { %2991 = vst.msk [vmem:[#allocation5 + $0x8] sm:$0xff] %vm44_vm0, %v2989_v55 }
 0xa30   :  { %2990 = vst.msk [vmem:[#allocation5] sm:$0xff] %vm44_vm0, %v2988_v57 }
 0xa31   :  { %3453 = shalt.err (!%p3450_p12)
}
 0xa32   :  { %s3454_s18 = scalar_lea.hbm %s4017_s5, 256 }
 0xa33   :  { %p3455_p13 = scmp.ne.s32.totalorder %s4017_s5, %s3454_s18  ;;  %p3458_p0 = scmp.lt.u32.totalorder %s3454_s18, %s4017_s5 }
 0xa35   :  { %p3460_p1 = pnand %p3458_p0, %p3455_p13 }
 0xa37   :  { %3463 = shalt.err (!%p3460_p1)
}
 0xa38   :  { %3003 = dma.vmem_to_hbm [thread:$0]  %s2998_s15, 256, %s4017_s5, [#allocation4], %s3469_s28, %s3469_s28, %s3470_s29  }
 0xa39   :  { %3466 = dma.done.wait [#allocation4], 256  }
 0xa3a   :  { %3467 = vsyncadd [#allocation4], 4294967040 }
 0xa3b   :  { %3007 = vsyncpa [#allocation3], 1 }
 0xa3c   :  { %3008 = vsyncpa [#allocation4], 1 }

</bundles_post_ra>
